<compile_context>
chip_gen: v6e
topology: v6e:2x2x1
jax: 0.10.0
libtpu: 0.0.40
codegen_flags: <defaults>
</compile_context>

<pallas_src>
import functools

import numpy as np
import jax
import jax.numpy as jnp
from jax import lax
from jax.experimental import pallas as pl
from jax.experimental.pallas import tpu as pltpu


# ---------------------------------------------------------------------------
# Tile-size / VMEM heuristics
# ---------------------------------------------------------------------------
def _vmem_capacity_bytes():
    try:
        return int(pltpu.get_tpu_info().vmem_capacity_bytes)
    except Exception:
        return 64 * 1024 * 1024   # conservative: v7x per-TensorCore VMEM


def _pick_block_k(B):
    # corr vectors are lane-tiled along the key axis, so block_k must be a
    # multiple of 128 (v6e/v7x prefer 256) or the full batch extent.
    if B % 256 == 0:
        return 256
    if B % 128 == 0:
        return 128
    return B


def _vmem_estimate(block_q, block_k, D, in_bytes):
    buf = 2                                              # default double-buffering
    q = 2 * buf * block_q * D * in_bytes                 # img_q + txt_q (resident per qi)
    k = 2 * buf * block_k * D * in_bytes                 # img_k + txt_k (streamed per kj)
    corr = 2 * buf * 8 * max(block_k, 128) * 4           # (1, tk) padded to (8, 128)
    mu = 2 * buf * 8 * max(D, 128) * 4                   # (1, D) padded
    out = buf * block_q * 128 * 4                        # lane-dense loss slab
    scratch = 4 * block_q * 128 * 4                      # m/l accumulators (padded)
    temps = 8 * block_q * block_k * 4                    # live f32 (tq, tk) temporaries
    return q + k + corr + mu + out + scratch + temps


def _pick_block_q(B, D, in_bytes, block_k, vmem_budget):
    cands = [t for t in (2048, 1536, 1024, 768, 512, 384, 256, 192, 128,
                         96, 64, 48, 32, 24, 16, 8)
             if t <= B and B % t == 0]
    if B not in cands:
        cands = [B] + cands                               # full extent is always legal
    feasible = [t for t in cands if _vmem_estimate(t, block_k, D, in_bytes) <= vmem_budget]
    if not feasible:
        feasible = [min(cands)]
    # Keep >= 2 query tiles when possible so the "parallel" qi axis can shard
    # across both TensorCores on v7x.
    multi = [t for t in feasible if B // t >= 2]
    return max(multi) if multi else max(feasible)


# ---------------------------------------------------------------------------
# Tiled, online-softmax CLIP loss. Grid = (query tiles, key tiles).
# ---------------------------------------------------------------------------
def _clip_loss_kernel(img_q_ref, txt_q_ref, img_k_ref, txt_k_ref,
                      corr_i_ref, corr_t_ref, img_mu_ref, txt_mu_ref,
                      loss_ref, m_i, l_i, m_t, l_t, *, scale):
    kj = pl.program_id(1)

    @pl.when(kj == 0)
    def _():
        m_i[...] = jnp.full_like(m_i, -jnp.inf)
        m_t[...] = jnp.full_like(m_t, -jnp.inf)
        l_i[...] = jnp.zeros_like(l_i)
        l_t[...] = jnp.zeros_like(l_t)

    dims = (((1,), (1,)), ((), ()))   # contract the feature (lane) dim of both

    # Raw similarities on the MXU in the native compute dtype, f32 accumulation.
    s_i = lax.dot_general(img_q_ref[...], txt_k_ref[...], dims,
                          preferred_element_type=jnp.float32)       # (tq, tk)
    s_t = lax.dot_general(txt_q_ref[...], img_k_ref[...], dims,
                          preferred_element_type=jnp.float32)       # (tq, tk)

    # Centering + scaling fused: corr is precomputed, pre-scaled (scale*mu@keys.T),
    # shape (1, tk) -> one multiply-subtract per matmul, no per-step correction GEMM.
    logits_i = s_i * scale - corr_i_ref[...]
    logits_t = s_t * scale - corr_t_ref[...]

    def online_update(logits, m_ref, l_ref):
        m_new = jnp.maximum(m_ref[...], jnp.max(logits, axis=-1, keepdims=True))
        alpha = jnp.exp(m_ref[...] - m_new)
        l_ref[...] = alpha * l_ref[...] + jnp.sum(jnp.exp(logits - m_new),
                                                  axis=-1, keepdims=True)
        m_ref[...] = m_new

    online_update(logits_i, m_i, l_i)
    online_update(logits_t, m_t, l_t)

    @pl.when(kj == pl.num_programs(1) - 1)
    def _():
        # labels = arange(B): the "correct" logit of row r is the diagonal element,
        # i.e. a row-wise dot of the matching resident q tiles (no (B,B) mask,
        # no extra HBM traffic). Runs once per query tile, not per key step.
        img_q = img_q_ref[...].astype(jnp.float32)
        txt_q = txt_q_ref[...].astype(jnp.float32)
        c_i = scale * jnp.sum((img_q - img_mu_ref[...]) * txt_q, axis=-1, keepdims=True)
        c_t = scale * jnp.sum((txt_q - txt_mu_ref[...]) * img_q, axis=-1, keepdims=True)
        lse_i = m_i[...] + jnp.log(l_i[...])
        lse_t = m_t[...] + jnp.log(l_t[...])
        per_row = 0.5 * ((lse_i - c_i) + (lse_t - c_t))              # (tq, 1)
        loss_ref[...] = jnp.broadcast_to(per_row, loss_ref.shape)    # lane-dense slab


def clip_loss(image_embed, text_embed, temperature, *,
              block_q=None, block_k=None, compute_dtype=None, key_buffers=None):
    """Pallas implementation of CLIP_Loss.forward (single device)."""
    B, D = image_embed.shape
    assert text_embed.shape == (B, D)
    scale = float(np.exp(np.log(1.0 / float(temperature))))   # logit_scale = exp(log(1/T))

    # --- small XLA pre-pass, hoisted out of the Pallas hot loop ---------------
    img_f32 = image_embed.astype(jnp.float32)
    txt_f32 = text_embed.astype(jnp.float32)
    img_mu = jnp.mean(img_f32, axis=0, keepdims=True)          # (1, D) f32
    txt_mu = jnp.mean(txt_f32, axis=0, keepdims=True)          # (1, D) f32

    cd = image_embed.dtype if compute_dtype is None else jnp.dtype(compute_dtype)
    img_cd = image_embed.astype(cd)                             # MXU inputs (e.g. bf16)
    txt_cd = text_embed.astype(cd)

    # Pre-scaled per-key centering corrections:
    #   (x - mu) @ y.T == x @ y.T - mu @ y.T,  so  corr = scale * mu @ y.T  (1, B).
    corr_i = scale * (img_mu @ txt_cd.astype(jnp.float32).T)    # (1, B) f32
    corr_t = scale * (txt_mu @ img_cd.astype(jnp.float32).T)    # (1, B) f32

    in_bytes = jnp.dtype(cd).itemsize
    capacity = _vmem_capacity_bytes()
    if block_k is None:
        block_k = _pick_block_k(B)
    if block_q is None:
        block_q = _pick_block_q(B, D, in_bytes, block_k, int(0.5 * capacity))
    assert B % block_q == 0 and B % block_k == 0, "tile sizes must divide batch"
    assert block_k == B or block_k % 128 == 0, "corr lane tiling needs block_k % 128 == 0"

    est = _vmem_estimate(block_q, block_k, D, in_bytes)
    vmem_limit = int(min(0.85 * capacity, max(1.5 * est, 32 * 2**20)))

    # Optional deeper buffering on the only streams that change every inner step.
    key_kw = dict(pipeline_mode=pl.Buffered(key_buffers)) if key_buffers else {}

    per_row = pl.pallas_call(
        functools.partial(_clip_loss_kernel, scale=scale),
        out_shape=jax.ShapeDtypeStruct((B, 128), jnp.float32),
        grid_spec=pltpu.PrefetchScalarGridSpec(
            num_scalar_prefetch=0,
            grid=(B // block_q, B // block_k),
            in_specs=[
                pl.BlockSpec((block_q, D), lambda qi, kj: (qi, 0)),              # img q rows
                pl.BlockSpec((block_q, D), lambda qi, kj: (qi, 0)),              # txt q rows
                pl.BlockSpec((block_k, D), lambda qi, kj: (kj, 0), **key_kw),    # img key rows
                pl.BlockSpec((block_k, D), lambda qi, kj: (kj, 0), **key_kw),    # txt key rows
                pl.BlockSpec((1, block_k), lambda qi, kj: (0, kj)),              # scale*img_mu@txt.T
                pl.BlockSpec((1, block_k), lambda qi, kj: (0, kj)),              # scale*txt_mu@img.T
                pl.BlockSpec((1, D), lambda qi, kj: (0, 0)),                     # img batch mean
                pl.BlockSpec((1, D), lambda qi, kj: (0, 0)),                     # txt batch mean
            ],
            out_specs=pl.BlockSpec((block_q, 128), lambda qi, kj: (qi, 0)),
            scratch_shapes=[pltpu.VMEM((block_q, 1), jnp.float32),
                            pltpu.VMEM((block_q, 1), jnp.float32),
                            pltpu.VMEM((block_q, 1), jnp.float32),
                            pltpu.VMEM((block_q, 1), jnp.float32)]),
        compiler_params=pltpu.CompilerParams(
            dimension_semantics=("parallel", "arbitrary"),
            vmem_limit_bytes=vmem_limit),
    )(img_cd, txt_cd, img_cd, txt_cd, corr_i, corr_t, img_mu, txt_mu)

    # All 128 lanes hold the same per-row loss -> contiguous read + reduce.
    return jnp.mean(per_row)


# ---------------------------------------------------------------------------
# Pure-JAX reference mirroring the PyTorch module (rank=0, single device).
# ---------------------------------------------------------------------------
def _reference_clip_loss(image_embed, text_embed, temperature, compute_dtype=None):
    B = image_embed.shape[0]
    labels = jnp.arange(B)
    img_f32 = image_embed.astype(jnp.float32)
    txt_f32 = text_embed.astype(jnp.float32)
    img_mu = jnp.mean(img_f32, axis=0, keepdims=True)
    txt_mu = jnp.mean(txt_f32, axis=0, keepdims=True)
    if compute_dtype is not None:   # mirror the kernel's MXU input rounding
        img_x = image_embed.astype(compute_dtype).astype(jnp.float32)
        txt_x = text_embed.astype(compute_dtype).astype(jnp.float32)
    else:
        img_x, txt_x = img_f32, txt_f32
    scale = jnp.exp(jnp.log(1.0 / temperature))
    logits_i = scale * (img_x - img_mu) @ txt_x.T
    logits_t = scale * (txt_x - txt_mu) @ img_x.T

    def ce(logits):
        logp = jax.nn.log_softmax(logits, axis=-1)
        return -jnp.mean(logp[jnp.arange(B), labels])

    return 0.5 * (ce(logits_i) + ce(logits_t))


if __name__ == "__main__":
    temperature = 0.1
    key = jax.random.PRNGKey(0)

    def make_embeds(k, B, D):
        k1, k2 = jax.random.split(k)
        img = jax.random.normal(k1, (B, D), dtype=jnp.float32)
        txt = jax.random.normal(k2, (B, D), dtype=jnp.float32)
        img = img / jnp.linalg.norm(img, axis=-1, keepdims=True)
        txt = txt / jnp.linalg.norm(txt, axis=-1, keepdims=True)
        return img, txt

    cases = [
        # 4 q-tiles x 2 k-tiles: exercises online softmax across key steps.
        dict(B=256, D=256, block_q=64, block_k=128, compute_dtype=None, tol=1e-3),
        # Auto tile selection; single key tile (block_k == B), full-extent corr block.
        dict(B=32, D=128, block_q=None, block_k=None, compute_dtype=None, tol=1e-3),
        # bf16 MXU inputs (f32 accumulation) vs a bf16-matched reference.
        dict(B=256, D=128, block_q=128, block_k=128, compute_dtype=jnp.bfloat16, tol=1e-2),
    ]
    for c in cases:
        key, sub = jax.random.split(key)
        img, txt = make_embeds(sub, c["B"], c["D"])

        loss = clip_loss(img, txt, temperature,
                         block_q=c["block_q"], block_k=c["block_k"],
                         compute_dtype=c["compute_dtype"])
        loss = jax.block_until_ready(loss)

        ref = _reference_clip_loss(img, txt, temperature,
                                   compute_dtype=c["compute_dtype"])
        np.testing.assert_allclose(np.asarray(loss), np.asarray(ref),
                                   rtol=c["tol"], atol=c["tol"])

    print("KERNEL_OK")
</pallas_src>

<mosaic_0001>
module attributes {stable_mosaic.version = 11 : i64} {
  func.func @_clip_loss_kernel(%arg0: i32, %arg1: i32, %arg2: memref<64x256xf32, #tpu.memory_space<vmem>>, %arg3: memref<64x256xf32, #tpu.memory_space<vmem>>, %arg4: memref<128x256xf32, #tpu.memory_space<vmem>>, %arg5: memref<128x256xf32, #tpu.memory_space<vmem>>, %arg6: memref<1x128xf32, #tpu.memory_space<vmem>>, %arg7: memref<1x128xf32, #tpu.memory_space<vmem>>, %arg8: memref<1x256xf32, #tpu.memory_space<vmem>>, %arg9: memref<1x256xf32, #tpu.memory_space<vmem>>, %arg10: memref<64x128xf32, #tpu.memory_space<vmem>>, %arg11: memref<64x1xf32, #tpu.memory_space<vmem>>, %arg12: memref<64x1xf32, #tpu.memory_space<vmem>>, %arg13: memref<64x1xf32, #tpu.memory_space<vmem>>, %arg14: memref<64x1xf32, #tpu.memory_space<vmem>>) attributes {dimension_semantics = [#tpu.dimension_semantics<parallel>, #tpu.dimension_semantics<arbitrary>], iteration_bounds = array<i64: 4, 2>, scalar_prefetch = 0 : i64, scratch_operands = 4 : i64, tpu.core_type = #tpu.core_type<tc>, window_params = [{transform_indices = @transform_0, window_bounds = array<i64: 64, 256>}, {transform_indices = @transform_1, window_bounds = array<i64: 64, 256>}, {transform_indices = @transform_2, window_bounds = array<i64: 128, 256>}, {transform_indices = @transform_3, window_bounds = array<i64: 128, 256>}, {transform_indices = @transform_4, window_bounds = array<i64: 1, 128>}, {transform_indices = @transform_5, window_bounds = array<i64: 1, 128>}, {pipeline_mode = #tpu.pipeline_mode<synchronous>, transform_indices = @transform_6, window_bounds = array<i64: 1, 256>}, {pipeline_mode = #tpu.pipeline_mode<synchronous>, transform_indices = @transform_7, window_bounds = array<i64: 1, 256>}, {transform_indices = @transform_8, window_bounds = array<i64: 64, 128>}]} {
    %c0_i32 = arith.constant 0 : i32
    %0 = arith.cmpi eq, %arg1, %c0_i32 : i32
    %1 = arith.extui %0 : i1 to i32
    %c0_i32_0 = arith.constant 0 : i32
    %2 = arith.cmpi ne, %1, %c0_i32_0 : i32
    scf.if %2 {
      %cst_40 = arith.constant 0xFF800000 : f32
      %56 = vector.broadcast %cst_40 : f32 to vector<64x1xf32>
      %c0_41 = arith.constant 0 : index
      %c0_42 = arith.constant 0 : index
      %57 = vector.load %arg11[%c0_41, %c0_42] : memref<64x1xf32, #tpu.memory_space<vmem>>, vector<64x1xf32>
      tpu.vector_store %arg11[%c0_41, %c0_42], %56 {strides = array<i32>} : memref<64x1xf32, #tpu.memory_space<vmem>>, vector<64x1xf32>,
      %cst_43 = arith.constant 0xFF800000 : f32
      %58 = vector.broadcast %cst_43 : f32 to vector<64x1xf32>
      %c0_44 = arith.constant 0 : index
      %c0_45 = arith.constant 0 : index
      %59 = vector.load %arg13[%c0_44, %c0_45] : memref<64x1xf32, #tpu.memory_space<vmem>>, vector<64x1xf32>
      tpu.vector_store %arg13[%c0_44, %c0_45], %58 {strides = array<i32>} : memref<64x1xf32, #tpu.memory_space<vmem>>, vector<64x1xf32>,
      %cst_46 = arith.constant 0.000000e+00 : f32
      %60 = vector.broadcast %cst_46 : f32 to vector<64x1xf32>
      %c0_47 = arith.constant 0 : index
      %c0_48 = arith.constant 0 : index
      %61 = vector.load %arg12[%c0_47, %c0_48] : memref<64x1xf32, #tpu.memory_space<vmem>>, vector<64x1xf32>
      tpu.vector_store %arg12[%c0_47, %c0_48], %60 {strides = array<i32>} : memref<64x1xf32, #tpu.memory_space<vmem>>, vector<64x1xf32>,
      %cst_49 = arith.constant 0.000000e+00 : f32
      %62 = vector.broadcast %cst_49 : f32 to vector<64x1xf32>
      %c0_50 = arith.constant 0 : index
      %c0_51 = arith.constant 0 : index
      %63 = vector.load %arg14[%c0_50, %c0_51] : memref<64x1xf32, #tpu.memory_space<vmem>>, vector<64x1xf32>
      tpu.vector_store %arg14[%c0_50, %c0_51], %62 {strides = array<i32>} : memref<64x1xf32, #tpu.memory_space<vmem>>, vector<64x1xf32>,
    } else {
    }
    %c0 = arith.constant 0 : index
    %c0_1 = arith.constant 0 : index
    %3 = vector.load %arg2[%c0, %c0_1] : memref<64x256xf32, #tpu.memory_space<vmem>>, vector<64x256xf32>
    %c0_2 = arith.constant 0 : index
    %c0_3 = arith.constant 0 : index
    %4 = vector.load %arg5[%c0_2, %c0_3] : memref<128x256xf32, #tpu.memory_space<vmem>>, vector<128x256xf32>
    %cst = arith.constant dense<0.000000e+00> : vector<64x128xf32>
    %5 = tpu.matmul %3, %4, %cst {dimension_numbers = #tpu.dot_dimension_numbers<[1], [1], [0], [0], [0, 0, 1, 0], [], []>} : vector<64x256xf32>, vector<128x256xf32>, vector<64x128xf32> -> vector<64x128xf32>
    %c0_4 = arith.constant 0 : index
    %c0_5 = arith.constant 0 : index
    %6 = vector.load %arg3[%c0_4, %c0_5] : memref<64x256xf32, #tpu.memory_space<vmem>>, vector<64x256xf32>
    %c0_6 = arith.constant 0 : index
    %c0_7 = arith.constant 0 : index
    %7 = vector.load %arg4[%c0_6, %c0_7] : memref<128x256xf32, #tpu.memory_space<vmem>>, vector<128x256xf32>
    %cst_8 = arith.constant dense<0.000000e+00> : vector<64x128xf32>
    %8 = tpu.matmul %6, %7, %cst_8 {dimension_numbers = #tpu.dot_dimension_numbers<[1], [1], [0], [0], [0, 0, 1, 0], [], []>} : vector<64x256xf32>, vector<128x256xf32>, vector<64x128xf32> -> vector<64x128xf32>
    %cst_9 = arith.constant 1.000000e+01 : f32
    %9 = vector.broadcast %cst_9 : f32 to vector<64x128xf32>
    %10 = arith.mulf %5, %9 : vector<64x128xf32>
    %c0_10 = arith.constant 0 : index
    %c0_11 = arith.constant 0 : index
    %11 = vector.load %arg6[%c0_10, %c0_11] : memref<1x128xf32, #tpu.memory_space<vmem>>, vector<1x128xf32>
    %12 = vector.broadcast %11 : vector<1x128xf32> to vector<64x128xf32>
    %13 = arith.subf %10, %12 : vector<64x128xf32>
    %cst_12 = arith.constant 1.000000e+01 : f32
    %14 = vector.broadcast %cst_12 : f32 to vector<64x128xf32>
    %15 = arith.mulf %8, %14 : vector<64x128xf32>
    %c0_13 = arith.constant 0 : index
    %c0_14 = arith.constant 0 : index
    %16 = vector.load %arg7[%c0_13, %c0_14] : memref<1x128xf32, #tpu.memory_space<vmem>>, vector<1x128xf32>
    %17 = vector.broadcast %16 : vector<1x128xf32> to vector<64x128xf32>
    %18 = arith.subf %15, %17 : vector<64x128xf32>
    %c0_15 = arith.constant 0 : index
    %c0_16 = arith.constant 0 : index
    %19 = vector.load %arg11[%c0_15, %c0_16] : memref<64x1xf32, #tpu.memory_space<vmem>>, vector<64x1xf32>
    %cst_17 = arith.constant dense<0xFF800000> : vector<64xf32>
    %20 = vector.multi_reduction <maximumf>, %13, %cst_17 [1] : vector<64x128xf32> to vector<64xf32>
    %21 = vector.shape_cast %20 : vector<64xf32> to vector<64x1xf32>
    %22 = arith.maximumf %19, %21 : vector<64x1xf32>
    %c0_18 = arith.constant 0 : index
    %c0_19 = arith.constant 0 : index
    %23 = vector.load %arg11[%c0_18, %c0_19] : memref<64x1xf32, #tpu.memory_space<vmem>>, vector<64x1xf32>
    %24 = arith.subf %23, %22 : vector<64x1xf32>
    %25 = math.exp %24 : vector<64x1xf32>
    %c0_20 = arith.constant 0 : index
    %c0_21 = arith.constant 0 : index
    %26 = vector.load %arg12[%c0_20, %c0_21] : memref<64x1xf32, #tpu.memory_space<vmem>>, vector<64x1xf32>
    %27 = arith.mulf %25, %26 : vector<64x1xf32>
    %28 = vector.broadcast %22 : vector<64x1xf32> to vector<64x128xf32>
    %29 = arith.subf %13, %28 : vector<64x128xf32>
    %30 = math.exp %29 : vector<64x128xf32>
    %cst_22 = arith.constant dense<0.000000e+00> : vector<64xf32>
    %31 = vector.multi_reduction <add>, %30, %cst_22 [1] : vector<64x128xf32> to vector<64xf32>
    %32 = vector.shape_cast %31 : vector<64xf32> to vector<64x1xf32>
    %33 = arith.addf %27, %32 : vector<64x1xf32>
    %c0_23 = arith.constant 0 : index
    %c0_24 = arith.constant 0 : index
    %34 = vector.load %arg12[%c0_23, %c0_24] : memref<64x1xf32, #tpu.memory_space<vmem>>, vector<64x1xf32>
    tpu.vector_store %arg12[%c0_23, %c0_24], %33 {strides = array<i32>} : memref<64x1xf32, #tpu.memory_space<vmem>>, vector<64x1xf32>,
    %c0_25 = arith.constant 0 : index
    %c0_26 = arith.constant 0 : index
    %35 = vector.load %arg11[%c0_25, %c0_26] : memref<64x1xf32, #tpu.memory_space<vmem>>, vector<64x1xf32>
    tpu.vector_store %arg11[%c0_25, %c0_26], %22 {strides = array<i32>} : memref<64x1xf32, #tpu.memory_space<vmem>>, vector<64x1xf32>,
    %c0_27 = arith.constant 0 : index
    %c0_28 = arith.constant 0 : index
    %36 = vector.load %arg13[%c0_27, %c0_28] : memref<64x1xf32, #tpu.memory_space<vmem>>, vector<64x1xf32>
    %cst_29 = arith.constant dense<0xFF800000> : vector<64xf32>
    %37 = vector.multi_reduction <maximumf>, %18, %cst_29 [1] : vector<64x128xf32> to vector<64xf32>
    %38 = vector.shape_cast %37 : vector<64xf32> to vector<64x1xf32>
    %39 = arith.maximumf %36, %38 : vector<64x1xf32>
    %c0_30 = arith.constant 0 : index
    %c0_31 = arith.constant 0 : index
    %40 = vector.load %arg13[%c0_30, %c0_31] : memref<64x1xf32, #tpu.memory_space<vmem>>, vector<64x1xf32>
    %41 = arith.subf %40, %39 : vector<64x1xf32>
    %42 = math.exp %41 : vector<64x1xf32>
    %c0_32 = arith.constant 0 : index
    %c0_33 = arith.constant 0 : index
    %43 = vector.load %arg14[%c0_32, %c0_33] : memref<64x1xf32, #tpu.memory_space<vmem>>, vector<64x1xf32>
    %44 = arith.mulf %42, %43 : vector<64x1xf32>
    %45 = vector.broadcast %39 : vector<64x1xf32> to vector<64x128xf32>
    %46 = arith.subf %18, %45 : vector<64x128xf32>
    %47 = math.exp %46 : vector<64x128xf32>
    %cst_34 = arith.constant dense<0.000000e+00> : vector<64xf32>
    %48 = vector.multi_reduction <add>, %47, %cst_34 [1] : vector<64x128xf32> to vector<64xf32>
    %49 = vector.shape_cast %48 : vector<64xf32> to vector<64x1xf32>
    %50 = arith.addf %44, %49 : vector<64x1xf32>
    %c0_35 = arith.constant 0 : index
    %c0_36 = arith.constant 0 : index
    %51 = vector.load %arg14[%c0_35, %c0_36] : memref<64x1xf32, #tpu.memory_space<vmem>>, vector<64x1xf32>
    tpu.vector_store %arg14[%c0_35, %c0_36], %50 {strides = array<i32>} : memref<64x1xf32, #tpu.memory_space<vmem>>, vector<64x1xf32>,
    %c0_37 = arith.constant 0 : index
    %c0_38 = arith.constant 0 : index
    %52 = vector.load %arg13[%c0_37, %c0_38] : memref<64x1xf32, #tpu.memory_space<vmem>>, vector<64x1xf32>
    tpu.vector_store %arg13[%c0_37, %c0_38], %39 {strides = array<i32>} : memref<64x1xf32, #tpu.memory_space<vmem>>, vector<64x1xf32>,
    %c1_i32 = arith.constant 1 : i32
    %53 = arith.cmpi eq, %arg1, %c1_i32 : i32
    %54 = arith.extui %53 : i1 to i32
    %c0_i32_39 = arith.constant 0 : i32
    %55 = arith.cmpi ne, %54, %c0_i32_39 : i32
    scf.if %55 {
      %c0_40 = arith.constant 0 : index
      %c0_41 = arith.constant 0 : index
      %56 = vector.load %arg2[%c0_40, %c0_41] : memref<64x256xf32, #tpu.memory_space<vmem>>, vector<64x256xf32>
      %c0_42 = arith.constant 0 : index
      %c0_43 = arith.constant 0 : index
      %57 = vector.load %arg3[%c0_42, %c0_43] : memref<64x256xf32, #tpu.memory_space<vmem>>, vector<64x256xf32>
      %c0_44 = arith.constant 0 : index
      %c0_45 = arith.constant 0 : index
      %58 = vector.load %arg8[%c0_44, %c0_45] : memref<1x256xf32, #tpu.memory_space<vmem>>, vector<1x256xf32>
      %59 = vector.broadcast %58 : vector<1x256xf32> to vector<64x256xf32>
      %60 = arith.subf %56, %59 : vector<64x256xf32>
      %61 = arith.mulf %60, %57 : vector<64x256xf32>
      %cst_46 = arith.constant dense<0.000000e+00> : vector<64xf32>
      %62 = vector.multi_reduction <add>, %61, %cst_46 [1] : vector<64x256xf32> to vector<64xf32>
      %63 = vector.shape_cast %62 : vector<64xf32> to vector<64x1xf32>
      %cst_47 = arith.constant 1.000000e+01 : f32
      %64 = vector.broadcast %cst_47 : f32 to vector<64x1xf32>
      %65 = arith.mulf %64, %63 : vector<64x1xf32>
      %c0_48 = arith.constant 0 : index
      %c0_49 = arith.constant 0 : index
      %66 = vector.load %arg9[%c0_48, %c0_49] : memref<1x256xf32, #tpu.memory_space<vmem>>, vector<1x256xf32>
      %67 = vector.broadcast %66 : vector<1x256xf32> to vector<64x256xf32>
      %68 = arith.subf %57, %67 : vector<64x256xf32>
      %69 = arith.mulf %68, %56 : vector<64x256xf32>
      %cst_50 = arith.constant dense<0.000000e+00> : vector<64xf32>
      %70 = vector.multi_reduction <add>, %69, %cst_50 [1] : vector<64x256xf32> to vector<64xf32>
      %71 = vector.shape_cast %70 : vector<64xf32> to vector<64x1xf32>
      %cst_51 = arith.constant 1.000000e+01 : f32
      %72 = vector.broadcast %cst_51 : f32 to vector<64x1xf32>
      %73 = arith.mulf %72, %71 : vector<64x1xf32>
      %c0_52 = arith.constant 0 : index
      %c0_53 = arith.constant 0 : index
      %74 = vector.load %arg11[%c0_52, %c0_53] : memref<64x1xf32, #tpu.memory_space<vmem>>, vector<64x1xf32>
      %c0_54 = arith.constant 0 : index
      %c0_55 = arith.constant 0 : index
      %75 = vector.load %arg12[%c0_54, %c0_55] : memref<64x1xf32, #tpu.memory_space<vmem>>, vector<64x1xf32>
      %76 = math.log %75 : vector<64x1xf32>
      %77 = arith.addf %74, %76 : vector<64x1xf32>
      %c0_56 = arith.constant 0 : index
      %c0_57 = arith.constant 0 : index
      %78 = vector.load %arg13[%c0_56, %c0_57] : memref<64x1xf32, #tpu.memory_space<vmem>>, vector<64x1xf32>
      %c0_58 = arith.constant 0 : index
      %c0_59 = arith.constant 0 : index
      %79 = vector.load %arg14[%c0_58, %c0_59] : memref<64x1xf32, #tpu.memory_space<vmem>>, vector<64x1xf32>
      %80 = math.log %79 : vector<64x1xf32>
      %81 = arith.addf %78, %80 : vector<64x1xf32>
      %82 = arith.subf %77, %65 : vector<64x1xf32>
      %83 = arith.subf %81, %73 : vector<64x1xf32>
      %84 = arith.addf %82, %83 : vector<64x1xf32>
      %cst_60 = arith.constant 5.000000e-01 : f32
      %85 = vector.broadcast %cst_60 : f32 to vector<64x1xf32>
      %86 = arith.mulf %85, %84 : vector<64x1xf32>
      %87 = vector.shape_cast %86 : vector<64x1xf32> to vector<64x1xf32>
      %88 = vector.broadcast %87 : vector<64x1xf32> to vector<64x128xf32>
      %c0_61 = arith.constant 0 : index
      %c0_62 = arith.constant 0 : index
      %89 = vector.load %arg10[%c0_61, %c0_62] : memref<64x128xf32, #tpu.memory_space<vmem>>, vector<64x128xf32>
      tpu.vector_store %arg10[%c0_61, %c0_62], %88 {strides = array<i32>} : memref<64x128xf32, #tpu.memory_space<vmem>>, vector<64x128xf32>,
    } else {
    }
    return
  }
  func.func @transform_0(%arg0: i32, %arg1: i32) -> (i32, i32) {
    %c0_i32 = arith.constant 0 : i32
    %c0_i32_0 = arith.constant 0 : i32
    return %arg0, %c0_i32 : i32, i32
  }
  func.func @transform_1(%arg0: i32, %arg1: i32) -> (i32, i32) {
    %c0_i32 = arith.constant 0 : i32
    %c0_i32_0 = arith.constant 0 : i32
    return %arg0, %c0_i32 : i32, i32
  }
  func.func @transform_2(%arg0: i32, %arg1: i32) -> (i32, i32) {
    %c0_i32 = arith.constant 0 : i32
    %c0_i32_0 = arith.constant 0 : i32
    return %arg1, %c0_i32 : i32, i32
  }
  func.func @transform_3(%arg0: i32, %arg1: i32) -> (i32, i32) {
    %c0_i32 = arith.constant 0 : i32
    %c0_i32_0 = arith.constant 0 : i32
    return %arg1, %c0_i32 : i32, i32
  }
  func.func @transform_4(%arg0: i32, %arg1: i32) -> (i32, i32) {
    %c0_i32 = arith.constant 0 : i32
    %c0_i32_0 = arith.constant 0 : i32
    return %c0_i32, %arg1 : i32, i32
  }
  func.func @transform_5(%arg0: i32, %arg1: i32) -> (i32, i32) {
    %c0_i32 = arith.constant 0 : i32
    %c0_i32_0 = arith.constant 0 : i32
    return %c0_i32, %arg1 : i32, i32
  }
  func.func @transform_6(%arg0: i32, %arg1: i32) -> (i32, i32) {
    %c0_i32 = arith.constant 0 : i32
    %c0_i32_0 = arith.constant 0 : i32
    %c0_i32_1 = arith.constant 0 : i32
    return %c0_i32, %c0_i32_0 : i32, i32
  }
  func.func @transform_7(%arg0: i32, %arg1: i32) -> (i32, i32) {
    %c0_i32 = arith.constant 0 : i32
    %c0_i32_0 = arith.constant 0 : i32
    %c0_i32_1 = arith.constant 0 : i32
    return %c0_i32, %c0_i32_0 : i32, i32
  }
  func.func @transform_8(%arg0: i32, %arg1: i32) -> (i32, i32) {
    %c0_i32 = arith.constant 0 : i32
    %c0_i32_0 = arith.constant 0 : i32
    return %arg0, %c0_i32 : i32, i32
  }
}

</mosaic_0001>

<bundles_post_ra>
// kernel: tpu_custom_call.1
= control target key start
LH: loop header
LB: loop body
LE: loop exit
PB: predicated region body
PF: predicated region fallthrough
CT: control target
= control target key end

     0   :  { %s3340_s0 = inlined_call_operand.hbm [shape: f32[256,256], index: 0, kind: input, shape index: {}]   ;;  %s3341_s1 = inlined_call_operand.hbm [shape: f32[256,256], index: 1, kind: input, shape index: {}]   ;;  %s3342_s2 = inlined_call_operand.hbm [shape: f32[256,256], index: 2, kind: input, shape index: {}]   ;;  %s3343_s3 = inlined_call_operand.hbm [shape: f32[256,256], index: 3, kind: input, shape index: {}]   ;;  %s3344_s4 = inlined_call_operand.vmem [shape: f32[1,256], index: 4, kind: input, shape index: {}]   ;;  %s3345_s5 = inlined_call_operand.vmem [shape: f32[1,256], index: 5, kind: input, shape index: {}]   ;;  %s3346_s6 = inlined_call_operand.vmem [shape: f32[1,256], index: 6, kind: input, shape index: {}]   ;;  %s3347_s7 = inlined_call_operand.vmem [shape: f32[1,256], index: 7, kind: input, shape index: {}]   ;;  %s3348_s8 = inlined_call_operand.hbm [shape: f32[256,128], index: 8, kind: output, shape index: {}]  }
   0x1   :  { %3364 = sst [smem:[#allocation26_spill]] %s3340_s0 }
   0x2   :  { %3365 = sst [smem:[#allocation27_spill]] %s3341_s1 }
   0x3   :  { %3366 = sst [smem:[#allocation28_spill]] %s3342_s2 }
   0x4   :  { %3367 = sst [smem:[#allocation29_spill]] %s3344_s4 }
   0x5   :  { %3368 = sst [smem:[#allocation30_spill]] %s3345_s5 }
   0x6   :  { %3369 = sst [smem:[#allocation31_spill]] %s3346_s6 }
   0x7   :  { %3370 = sst [smem:[#allocation32_spill]] %s3347_s7 }
   0x8   :  { %3371 = sst [smem:[#allocation33_spill]] %s3348_s8 }
   0x9   :  { %13 = vsyncpa [#allocation7], 0 }
   0xa   :  { %15 = vsyncpa [#allocation7 + $0x1], 0 }
   0xb   :  { %16 = vsyncpa [#allocation10], 0 }
   0xc   :  { %18 = vsyncpa [#allocation10 + $0x1], 0 }
   0xd   :  { %19 = vsyncpa [#allocation13], 0 }
   0xe   :  { %21 = vsyncpa [#allocation13 + $0x1], 0 }
   0xf   :  { %22 = vsyncpa [#allocation8], 0 }
  0x10   :  { %24 = vsyncpa [#allocation8 + $0x1], 0  ;;  %s2335_s27 = smov 0   ;;  %s2337_s28 = smov 0  }
  0x11   :  { %s2339_s29 = smov 0   ;;  %s2341_s30 = smov 0  }
  0x12   :  { %s2343_s9 = smov 0   ;;  %s2345_s10 = smov 0  }
  0x13   :  { %s2347_s11 = smov 0   ;;  %s2349_s12 = smov 0  }
  0x14   :  { %s2351_s13 = smov 0   ;;  %s2353_s14 = smov 0  }
  0x15   :  { %s2355_s15 = smov 0  }
  0x16 LB: > { %3372 = sst [smem:[#allocation20_spill]] %s2247_s30  ;;  %s2391_s16 = sadd.s32 4294967295, %s2275_s15   ;;  %s2275_s15 = sphi %s2355_s15, %s30_s15   ;;  %s2271_s14 = sphi %s2353_s14, %s3432_s14   ;;  %s2267_s13 = sphi %s2351_s13, %s3431_s13   ;;  %s2263_s12 = sphi %s2349_s12, %s3430_s12   ;;  %s2259_s11 = sphi %s2347_s11, %s3429_s11   ;;  %s2255_s10 = sphi %s2345_s10, %s3428_s10   ;;  %s2251_s9 = sphi %s2343_s9, %s3427_s9   ;;  %s2247_s30 = sphi %s2341_s30, %s3426_s30   ;;  %s2243_s29 = sphi %s2339_s29, %s3425_s29   ;;  %s2239_s28 = sphi %s2337_s28, %s3424_s28   ;;  %s2235_s27 = sphi %s2335_s27, %s3423_s27  }
  0x17   : > { %3373 = sst [smem:[#allocation21_spill]] %s2263_s12  ;;  %s1763_s17 = sadd.s32 4294967294, %s2275_s15  }
  0x18   : > { %p56_p0 = scmp.ne.s32.totalorder %s2255_s10, %s2251_s9  ;;  %p57_p1 = scmp.eq.s32.totalorder %s2275_s15, 0 }
  0x19   : > { %p62_p2 = scmp.ne.s32.totalorder %s2251_s9, %s2247_s30  ;;  %p3356_p3 = scmp.eq.s32.totalorder %s2391_s16, 0 }
  0x1a   : > { %p58_p4 = por %p57_p1, %p56_p0  ;;  %p258_p5 = scmp.eq.s32.totalorder %s2391_s16, 7 }
  0x1b   : > { %p2407_p6 = por %p3356_p3, %p62_p2  ;;  %p264_p7 = scmp.eq.s32.totalorder %s1763_s17, 7 }
  0x1c   : > { %p2411_p8 = por %p258_p5, %p56_p0  ;;  %p3355_p10 = scmp.lt.s32.totalorder %s2275_s15, 8 }
  0x1d   : > { %p2415_p9 = por %p264_p7, %p62_p2  ;;  %s3352_s23 = sand.u32 1, %s2255_s10  }
  0x1e   : > { %s3375_s21 = scalar_select %p2411_p8, 1, 0 }
  0x1f   : > { %s3377_s22 = scalar_select %p2415_p9, 1, 0 }
  0x20   : > { %3376 = sst [smem:[#allocation22_spill]] %s3375_s21  ;;  %s1798_s24 = sshll.u32 %s2271_s14, 11 }
  0x21   : > { %3378 = sst [smem:[#allocation23_spill]] %s3377_s22  ;;  %s2424_s25 = sshll.u32 %s3352_s23, 7 }
  0x22   : > { %p2428_p11 = pnand %p3355_p10, %p58_p4  ;;  %s312_s17 = sand.u32 1, %s2275_s15  }
  0x23   : > { %s3380_s1 = sld [smem:[#allocation27_spill]]  ;;  %s316_s30 = scalar_lea.vmem [#allocation9], %s2424_s25 }
  0x24   : > { %s324_s8 = sshll.u32 %s316_s30, 4  ;;  %p1782_p12 = scmp.ge.s32.totalorder %s2275_s15, 1  ;;  %s325_s8 = int_to_ptr.vmem [resolvable:$true] %s324_s8 }
  0x25   : > { %s2440_s23 = scalar_lea.sflag [#allocation10], %s312_s17  ;;  %p2033_p13 = pneg %p2428_p11 }
  0x26   : > { %s2044_s21 = scalar_lea.vmem %s325_s8, 2048  ;;  %s2277_s12 = smov [#allocation9]  }
  0x27   : > { %p2045_p0 = scmp.ne.s32.totalorder %s325_s8, %s2044_s21  ;;  %s2049_s7 = sshll.u32 %s2277_s12, 4  ;;  %s2050_s7 = int_to_ptr.vmem [resolvable:$false] %s2049_s7 }
  0x28   : > { %s2051_s6 = scalar_lea.vmem %s2050_s7, 4096  ;;  %p2052_p5 = scmp.lt.s32.totalorder %s325_s8, %s2050_s7 }
  0x29   : > { %s323_s22 = scalar_lea.hbm %s3380_s1, %s1798_s24  ;;  %p2047_p2 = pnand %p2045_p0, %p2033_p13 }
  0x2a   : > { %p2053_p7 = scmp.lt.s32.totalorder %s2051_s6, %s2044_s21 }
  0x2b   : > { %p2048_p4 = pneg %p2047_p2 }
  0x2c   : > { %p2054_p10 = por %p2053_p7, %p2052_p5 }
  0x2e   : > { %p2055_p3 = pnand %p2054_p10, %p2048_p4 }
  0x30   : > { %2058 = shalt.err (!%p2055_p3)
}
  0x31   : > { %s3357_s30 = smov 256   ;;  %s3359_s18 = smov 16  }
  0x32   : > { %1822 = dma.hbm_to_vmem [thread:$0]  (!%p2428_p11), %s323_s22, 2048, %s325_s8, %s2440_s23, %s3357_s30, %s3357_s30, %s3359_s18  }
  0x33   : > { %p388_p0 = scmp.lt.s32.totalorder %s2275_s15, 9  ;;  %s3382_s0 = sld [smem:[#allocation26_spill]] }
  0x34   : > { %s294_s21 = scalar_lea.vmem [#allocation6], %s2424_s25  ;;  %s3383_s1 = sand.u32 1, %s2255_s10  }
  0x35   : > { %p2456_p2 = pnand %p1782_p12, %p388_p0  ;;  %s302_s17 = sshll.u32 %s294_s21, 4  ;;  %s303_s17 = int_to_ptr.vmem [resolvable:$true] %s302_s17 }
  0x36   : > { %s291_s5 = scalar_lea.sflag [#allocation7], %s3383_s1  ;;  %s2072_s4 = scalar_lea.vmem %s303_s17, 2048 }
  0x37   : > { %p2073_p3 = scmp.ne.s32.totalorder %s303_s17, %s2072_s4  ;;  %s2280_s8 = smov [#allocation6]  }
  0x38   : > { %s2077_s22 = sshll.u32 %s2280_s8, 4  ;;  %s2078_s22 = int_to_ptr.vmem [resolvable:$false] %s2077_s22 }
  0x39   : > { %s301_s19 = scalar_lea.hbm %s3382_s0, %s1798_s24  ;;  %p2075_p10 = pnand %p2073_p3, %p2033_p13 }
  0x3a   : > { %s2079_s30 = scalar_lea.vmem %s2078_s22, 4096  ;;  %p2080_p12 = scmp.lt.s32.totalorder %s303_s17, %s2078_s22 }
  0x3b   : > { %p2076_p4 = pneg %p2075_p10  ;;  %p2081_p5 = scmp.lt.s32.totalorder %s2079_s30, %s2072_s4 }
  0x3d   : > { %p2082_p7 = por %p2081_p5, %p2080_p12 }
  0x3f   : > { %p2083_p0 = pnand %p2082_p7, %p2076_p4 }
  0x41   : > { %2086 = shalt.err (!%p2083_p0)
}
  0x42   : > { %s3384_s24 = smov 256   ;;  %s39_s1 = sadd.s32 1, %s2267_s13 }
  0x43   : > { %1819 = dma.hbm_to_vmem [thread:$0]  (!%p2428_p11), %s301_s19, 2048, %s303_s17, %s291_s5, %s3384_s24, %s3384_s24, %s3359_s18  }
  0x44   : > { %p40_p13 = scmp.ge.s32.totalorder %s39_s1, 2  ;;  %s101_s4 = sadd.s32 1, %s2243_s29 }
  0x45   : > { %p108_p3 = scmp.ne.s32.totalorder %s2243_s29, %s2239_s28  ;;  %p114_p10 = scmp.ne.s32.totalorder %s2239_s28, %s2235_s27 }
  0x46   : > { %s3434_s1 = smov (%p40_p13, %s39_s1), 0  ;;  %s3386_s25 = sadd.s32 1, %s2271_s14 }
  0x47   : > { %3385 = sst [smem:[#allocation24_spill]] %s3434_s1  ;;  %s3436_s25 = smov (!%p40_p13, %s3386_s25), %s2271_s14 }
  0x48   : > { %s98_s26 = ssub.s32 %s2267_s13, %s3434_s1  ;;  %p2491_p4 = por %p108_p3, %p57_p1 }
  0x49   : > { %p44_p11 = scmp.ge.s32.totalorder %s3436_s25, 4  ;;  %p99_p12 = scmp.eq.s32.totalorder %s98_s26, 0 }
  0x4a   : > { %p3388_p5 = scmp.eq.s32.totalorder %s2391_s16, 0  ;;  %s3363_s27 = sand.u32 1, %s2243_s29  }
  0x4b   : > { %s3438_s25 = smov (%p44_p11, %s3436_s25), 0  ;;  %s1774_s19 = sshll.u32 %s3363_s27, 8 }
  0x4c   : > { %p2497_p7 = por %p114_p10, %p3388_p5  ;;  %3390 = sst [smem:[#allocation25_spill]] %s3438_s25 }
  0x4d   : > { %s2505_s7 = scalar_select %p99_p12, %s2243_s29, %s101_s4  }
  0x4e   : > { %s46_s12 = ssub.s32 %s2271_s14, %s3438_s25  ;;  %s1802_s21 = sshll.u32 %s2267_s13, 12 }
  0x4f   : > { %p47_p1 = scmp.eq.s32.totalorder %s46_s12, 0  ;;  %s338_s17 = scalar_lea.vmem [#allocation11], %s1774_s19 }
  0x50   : > { %s346_s8 = sshll.u32 %s338_s17, 4  ;;  %s3391_s22 = sadd.s32 1, %s2255_s10  ;;  %s347_s8 = int_to_ptr.vmem [resolvable:$true] %s346_s8 }
  0x51   : > { %s2515_s26 = scalar_select %p47_p1, %s2255_s10, %s3391_s22  }
  0x52   : > { %s3392_s2 = sld [smem:[#allocation28_spill]]  ;;  %p3393_p0 = scmp.lt.s32.totalorder %s2275_s15, 8 }
  0x53   : > { %s2531_s12 = scalar_lea.hbm %s3343_s3, %s1802_s21  ;;  %s360_s17 = scalar_lea.vmem [#allocation12], %s1774_s19 }
  0x54   : > { %p2524_p13 = pnand %p3393_p0, %p2491_p4  ;;  %s368_s22 = sshll.u32 %s360_s17, 4  ;;  %s369_s22 = int_to_ptr.vmem [resolvable:$true] %s368_s22 }
  0x55   : > { %s2100_s0 = scalar_lea.vmem %s347_s8, 4096  ;;  %s2281_s18 = smov [#allocation11]  }
  0x56   : > { %p2089_p3 = pneg %p2524_p13  ;;  %p2101_p10 = scmp.ne.s32.totalorder %s347_s8, %s2100_s0 }
  0x57   : > { %s2105_s30 = sshll.u32 %s2281_s18, 4  ;;  %s2106_s30 = int_to_ptr.vmem [resolvable:$false] %s2105_s30 }
  0x58   : > { %s345_s1 = scalar_lea.hbm %s3392_s2, %s1802_s21  ;;  %p2103_p11 = pnand %p2101_p10, %p2089_p3 }
  0x59   : > { %s2107_s2 = scalar_lea.vmem %s2106_s30, 8192  ;;  %p2108_p12 = scmp.lt.s32.totalorder %s347_s8, %s2106_s30 }
  0x5a   : > { %p2104_p4 = pneg %p2103_p11  ;;  %p2109_p5 = scmp.lt.s32.totalorder %s2107_s2, %s2100_s0 }
  0x5c   : > { %p2110_p1 = por %p2109_p5, %p2108_p12 }
  0x5e   : > { %p2111_p0 = pnand %p2110_p1, %p2104_p4 }
  0x60   : > { %2114 = shalt.err (!%p2111_p0)
}
  0x61   : > { %s3395_s25 = smov 16   ;;  %s3396_s27 = sand.u32 1, %s2243_s29  }
  0x62   : > { %1825 = dma.hbm_to_vmem [thread:$0]  (!%p2524_p13), %s345_s1, 4096, %s347_s8, %s2440_s23, %s3384_s24, %s3384_s24, %s3395_s25  }
  0x63   : > { %s357_s19 = scalar_lea.sflag [#allocation13], %s3396_s27  ;;  %s2128_s21 = scalar_lea.vmem %s369_s22, 4096 }
  0x64   : > { %p2129_p10 = scmp.ne.s32.totalorder %s369_s22, %s2128_s21  ;;  %s2282_s2 = smov [#allocation12]  }
  0x65   : > { %s2133_s17 = sshll.u32 %s2282_s2, 4  ;;  %s2134_s17 = int_to_ptr.vmem [resolvable:$false] %s2133_s17 }
  0x66   : > { %p2131_p11 = pnand %p2129_p10, %p2089_p3  ;;  %s2135_s0 = scalar_lea.vmem %s2134_s17, 8192 }
  0x67   : > { %p2136_p4 = scmp.lt.s32.totalorder %s369_s22, %s2134_s17  ;;  %p2137_p5 = scmp.lt.s32.totalorder %s2135_s0, %s2128_s21 }
  0x68   : > { %p2132_p12 = pneg %p2131_p11 }
  0x69   : > { %p2138_p1 = por %p2137_p5, %p2136_p4 }
  0x6b   : > { %p2139_p0 = pnand %p2138_p1, %p2132_p12 }
  0x6d   : > { %2142 = shalt.err (!%p2139_p0)
}
  0x6e   : > { %1828 = dma.hbm_to_vmem [thread:$0]  (!%p2524_p13), %s2531_s12, 4096, %s369_s22, %s357_s19, %s3384_s24, %s3384_s24, %s3395_s25  }
  0x6f   : > { %392 = sbr.rel (%p2456_p2) target bundleno = 1233 (0x4d1), region = 52  ;;  %s2558_s23 = sand.u32 (!%p2456_p2), 1, %s2251_s9  }
  0x70   : > { %s1783_s1 = sshll.u32 (!%p2456_p2), %s2558_s23, 7  ;;  %s395_s8 = scalar_lea.sflag (!%p2456_p2), [#allocation7], %s2558_s23 }
  0x71   : > { %s2562_s18 = scalar_lea.vmem (!%p2456_p2), [#allocation6], %s1783_s1 }
  0x74   : > { %2214 = dma.done.wait (%p2407_p6), %s395_s8, 2048  }
  0x75   : > { %2216 = vsyncadd (%p2407_p6), %s395_s8, 4294965248  ;;  %s403_s24 = sand.u32 1, %s2391_s16   ;;  %s2569_s4 = scalar_lea.vmem [#allocation9], %s1783_s1 }
  0x76   : > { %s404_s6 = scalar_lea.sflag [#allocation10], %s403_s24 }
  0x77   : > { %2218 = dma.done.wait (%p2407_p6), %s404_s6, 2048  }
  0x78   : > { %2220 = vsyncadd (%p2407_p6), %s404_s6, 4294965248  ;;  %s414_s12 = sand.u32 1, %s2239_s28  }
  0x79   : > { %s1785_s22 = sshll.u32 %s414_s12, 8 }
  0x7a   : > { %s2576_s30 = scalar_lea.vmem [#allocation11], %s1785_s22 }
  0x7b   : > { %2222 = dma.done.wait (%p2497_p7), %s404_s6, 4096  }
  0x7c   : > { %2224 = vsyncadd (%p2497_p7), %s404_s6, 4294963200  ;;  %s422_s16 = scalar_lea.sflag [#allocation13], %s414_s12  ;;  %s2582_s25 = scalar_lea.vmem [#allocation12], %s1785_s22 }
  0x7d   : > { %2226 = dma.done.wait (%p2497_p7), %s422_s16, 4096  }
  0x7e   : > { %2228 = vsyncadd (%p2497_p7), %s422_s16, 4294963200  ;;  %s1787_s20 = sshll.u32 %s2558_s23, 6  ;;  %p483_p6 = scmp.lt.s32.totalorder %s2259_s11, 1 }
  0x7f   : > { %s3397_s2 = sld [smem:[#allocation29_spill]]  ;;  %s2601_s6 = scalar_lea.vmem [#allocation14], %s1787_s20 }
  0x80   : > { %s2591_s27 = scalar_select %p483_p6, %s2259_s11, 1 }
  0x81   : > { %s3398_s8 = sld [smem:[#allocation30_spill]]  ;;  %p1788_p2 = scmp.ne.s32.totalorder %s2259_s11, 0 }
  0x83   : > { %493 = sbr.rel (%p1788_p2) target bundleno = 153 (0x99), region = 72 }
  0x85   : > { %s485_s17 = scalar_lea.vmem %s3397_s2, %s2591_s27 }
  0x87   : > { %s488_s24 = scalar_lea.vmem %s3398_s8, %s2591_s27 }
  0x88   : > { %vm494_vm0 = vcmask 7168   ;;  %v2283_v0 = vmov -inf   ;;  %v2284_v1 = vmov 0.0  }
  0x89   : > { %495 = vst.msk [vmem:[#allocation2] sm:$0xff] %vm494_vm0, %v2283_v0  ;;  %496 = vst.msk [vmem:[#allocation2 + $0x8] sm:$0xff] %vm494_vm0, %v2283_v0 }
  0x8a   : > { %497 = vst.msk [vmem:[#allocation2 + $0x10] sm:$0xff] %vm494_vm0, %v2283_v0  ;;  %498 = vst.msk [vmem:[#allocation2 + $0x18] sm:$0xff] %vm494_vm0, %v2283_v0 }
  0x8b   : > { %499 = vst.msk [vmem:[#allocation2 + $0x20] sm:$0xff] %vm494_vm0, %v2283_v0  ;;  %500 = vst.msk [vmem:[#allocation2 + $0x28] sm:$0xff] %vm494_vm0, %v2283_v0 }
  0x8c   : > { %501 = vst.msk [vmem:[#allocation2 + $0x30] sm:$0xff] %vm494_vm0, %v2283_v0  ;;  %502 = vst.msk [vmem:[#allocation2 + $0x38] sm:$0xff] %vm494_vm0, %v2283_v0 }
  0x8d   : > { %503 = vst.msk [vmem:[#allocation4] sm:$0xff] %vm494_vm0, %v2283_v0  ;;  %504 = vst.msk [vmem:[#allocation4 + $0x8] sm:$0xff] %vm494_vm0, %v2283_v0 }
  0x8e   : > { %505 = vst.msk [vmem:[#allocation4 + $0x10] sm:$0xff] %vm494_vm0, %v2283_v0  ;;  %506 = vst.msk [vmem:[#allocation4 + $0x18] sm:$0xff] %vm494_vm0, %v2283_v0 }
  0x8f   : > { %507 = vst.msk [vmem:[#allocation4 + $0x20] sm:$0xff] %vm494_vm0, %v2283_v0  ;;  %508 = vst.msk [vmem:[#allocation4 + $0x28] sm:$0xff] %vm494_vm0, %v2283_v0 }
  0x90   : > { %509 = vst.msk [vmem:[#allocation4 + $0x30] sm:$0xff] %vm494_vm0, %v2283_v0  ;;  %510 = vst.msk [vmem:[#allocation4 + $0x38] sm:$0xff] %vm494_vm0, %v2283_v0 }
  0x91   : > { %511 = vst.msk [vmem:[#allocation3] sm:$0xff] %vm494_vm0, %v2284_v1  ;;  %512 = vst.msk [vmem:[#allocation3 + $0x8] sm:$0xff] %vm494_vm0, %v2284_v1 }
  0x92   : > { %513 = vst.msk [vmem:[#allocation3 + $0x10] sm:$0xff] %vm494_vm0, %v2284_v1  ;;  %514 = vst.msk [vmem:[#allocation3 + $0x18] sm:$0xff] %vm494_vm0, %v2284_v1 }
  0x93   : > { %515 = vst.msk [vmem:[#allocation3 + $0x20] sm:$0xff] %vm494_vm0, %v2284_v1  ;;  %516 = vst.msk [vmem:[#allocation3 + $0x28] sm:$0xff] %vm494_vm0, %v2284_v1 }
  0x94   : > { %517 = vst.msk [vmem:[#allocation3 + $0x30] sm:$0xff] %vm494_vm0, %v2284_v1  ;;  %518 = vst.msk [vmem:[#allocation3 + $0x38] sm:$0xff] %vm494_vm0, %v2284_v1 }
  0x95   : > { %519 = vst.msk [vmem:[#allocation5] sm:$0xff] %vm494_vm0, %v2284_v1  ;;  %520 = vst.msk [vmem:[#allocation5 + $0x8] sm:$0xff] %vm494_vm0, %v2284_v1 }
  0x96   : > { %521 = vst.msk [vmem:[#allocation5 + $0x10] sm:$0xff] %vm494_vm0, %v2284_v1  ;;  %522 = vst.msk [vmem:[#allocation5 + $0x18] sm:$0xff] %vm494_vm0, %v2284_v1 }
  0x97   : > { %523 = vst.msk [vmem:[#allocation5 + $0x20] sm:$0xff] %vm494_vm0, %v2284_v1  ;;  %524 = vst.msk [vmem:[#allocation5 + $0x28] sm:$0xff] %vm494_vm0, %v2284_v1 }
  0x98   : > { %525 = vst.msk [vmem:[#allocation5 + $0x30] sm:$0xff] %vm494_vm0, %v2284_v1  ;;  %526 = vst.msk [vmem:[#allocation5 + $0x38] sm:$0xff] %vm494_vm0, %v2284_v1 }
  0x99 PF: > { %v574_v2 = vld [vmem:[%s2582_s25 + $0xf8] sm:$0xff]  ;;  %v573_v4 = vld [vmem:[%s2582_s25 + $0xf0] sm:$0xff]  ;;  %v572_v6 = vld [vmem:[%s2582_s25 + $0xe8] sm:$0xff]  ;;  %vm1039_vm1 = vcmask 7168   ;;  %p1791_p7 = scmp.ne.s32.totalorder %s2259_s11, 1 }
  0x9a   : > { %v727_v3 = vld [vmem:[%s2576_s30 + $0xf8] sm:$0xff]  ;;  %575 = vmatprep.subr.mxu0 %v574_v2  ;;  %v726_v5 = vld [vmem:[%s2576_s30 + $0xf0] sm:$0xff]  ;;  %v725_v7 = vld [vmem:[%s2576_s30 + $0xe8] sm:$0xff]  ;;  %s3414_s19 = sld [smem:[#allocation31_spill]] (!%p1791_p7) }
  0x9b   : > { %728 = vmatprep.subr.mxu1 %v727_v3  ;;  %576 = vmatpush1.xpose.msra.mxu0 %v573_v4  ;;  %v571_v8 = vld [vmem:[%s2582_s25 + $0xe0] sm:$0xff]  ;;  %v570_v10 = vld [vmem:[%s2582_s25 + $0xd8] sm:$0xff]  ;;  %v569_v12 = vld [vmem:[%s2582_s25 + $0xd0] sm:$0xff]  ;;  %s3415_s2 = sld [smem:[#allocation32_spill]] (!%p1791_p7) }
  0x9c   : > { %729 = vmatpush1.xpose.msra.mxu1 %v726_v5  ;;  %577 = vmatprep.subr.mxu0 %v572_v6  ;;  %v724_v9 = vld [vmem:[%s2576_s30 + $0xe0] sm:$0xff]  ;;  %v723_v11 = vld [vmem:[%s2576_s30 + $0xd8] sm:$0xff]  ;;  %v722_v13 = vld [vmem:[%s2576_s30 + $0xd0] sm:$0xff] }
  0x9d   : > { %730 = vmatprep.subr.mxu1 %v725_v7  ;;  %v568_v14 = vld [vmem:[%s2582_s25 + $0xc8] sm:$0xff]  ;;  %v567_v16 = vld [vmem:[%s2582_s25 + $0xc0] sm:$0xff]  ;;  %v566_v18 = vld [vmem:[%s2582_s25 + $0xb8] sm:$0xff] }
  0x9e   : > { %v721_v15 = vld [vmem:[%s2576_s30 + $0xc8] sm:$0xff]  ;;  %v720_v17 = vld [vmem:[%s2576_s30 + $0xc0] sm:$0xff]  ;;  %v719_v19 = vld [vmem:[%s2576_s30 + $0xb8] sm:$0xff] }
  0x9f   : > { %578 = vmatpush1.xpose.msra.mxu0 %v571_v8  ;;  %v565_v20 = vld [vmem:[%s2582_s25 + $0xb0] sm:$0xff]  ;;  %v564_v22 = vld [vmem:[%s2582_s25 + $0xa8] sm:$0xff]  ;;  %v563_v24 = vld [vmem:[%s2582_s25 + $0xa0] sm:$0xff] }
  0xa0   : > { %731 = vmatpush1.xpose.msra.mxu1 %v724_v9  ;;  %579 = vmatprep.subr.mxu0 %v570_v10  ;;  %v718_v21 = vld [vmem:[%s2576_s30 + $0xb0] sm:$0xff]  ;;  %v717_v23 = vld [vmem:[%s2576_s30 + $0xa8] sm:$0xff]  ;;  %v716_v25 = vld [vmem:[%s2576_s30 + $0xa0] sm:$0xff] }
  0xa1   : > { %732 = vmatprep.subr.mxu1 %v723_v11  ;;  %v562_v26 = vld [vmem:[%s2582_s25 + $0x98] sm:$0xff]  ;;  %v528_v28 = vld [vmem:[%s2562_s18 + $0x8] sm:$0xff]  ;;  %v561_v30 = vld [vmem:[%s2582_s25 + $0x90] sm:$0xff] }
  0xa2   : > { %v715_v27 = vld [vmem:[%s2576_s30 + $0x98] sm:$0xff]  ;;  %v681_v29 = vld [vmem:[%s2569_s4 + $0x8] sm:$0xff]  ;;  %v714_v31 = vld [vmem:[%s2576_s30 + $0x90] sm:$0xff]  ;;  %639 = vmatprep.mubr.f32.mxu0 %v528_v28 }
  0xa3   : > { %580 = vmatpush1.xpose.msra.mxu0 %v569_v12  ;;  %v560_v32 = vld [vmem:[%s2582_s25 + $0x88] sm:$0xff]  ;;  %792 = vmatprep.mubr.f32.mxu1 %v681_v29  ;;  %v559_v34 = vld [vmem:[%s2582_s25 + $0x80] sm:$0xff]  ;;  %v558_v36 = vld [vmem:[%s2582_s25 + $0x78] sm:$0xff] }
  0xa4   : > { %733 = vmatpush1.xpose.msra.mxu1 %v722_v13  ;;  %581 = vmatprep.subr.mxu0 %v568_v14  ;;  %v713_v33 = vld [vmem:[%s2576_s30 + $0x88] sm:$0xff]  ;;  %v712_v35 = vld [vmem:[%s2576_s30 + $0x80] sm:$0xff]  ;;  %v711_v37 = vld [vmem:[%s2576_s30 + $0x78] sm:$0xff] }
  0xa5   : > { %734 = vmatprep.subr.mxu1 %v721_v15  ;;  %v557_v38 = vld [vmem:[%s2582_s25 + $0x70] sm:$0xff]  ;;  %v556_v40 = vld [vmem:[%s2582_s25 + $0x68] sm:$0xff]  ;;  %v555_v42 = vld [vmem:[%s2582_s25 + $0x60] sm:$0xff] }
  0xa6   : > { %v710_v39 = vld [vmem:[%s2576_s30 + $0x70] sm:$0xff]  ;;  %v709_v41 = vld [vmem:[%s2576_s30 + $0x68] sm:$0xff]  ;;  %v708_v43 = vld [vmem:[%s2576_s30 + $0x60] sm:$0xff] }
  0xa7   : > { %582 = vmatpush1.xpose.msra.mxu0 %v567_v16  ;;  %v554_v44 = vld [vmem:[%s2582_s25 + $0x58] sm:$0xff]  ;;  %v553_v46 = vld [vmem:[%s2582_s25 + $0x50] sm:$0xff]  ;;  %v552_v48 = vld [vmem:[%s2582_s25 + $0x48] sm:$0xff] }
  0xa8   : > { %735 = vmatpush1.xpose.msra.mxu1 %v720_v17  ;;  %583 = vmatprep.subr.mxu0 %v566_v18  ;;  %v707_v45 = vld [vmem:[%s2576_s30 + $0x58] sm:$0xff]  ;;  %v706_v47 = vld [vmem:[%s2576_s30 + $0x50] sm:$0xff]  ;;  %v705_v49 = vld [vmem:[%s2576_s30 + $0x48] sm:$0xff] }
  0xa9   : > { %736 = vmatprep.subr.mxu1 %v719_v19  ;;  %v551_v50 = vld [vmem:[%s2582_s25 + $0x40] sm:$0xff]  ;;  %v550_v52 = vld [vmem:[%s2582_s25 + $0x38] sm:$0xff]  ;;  %v549_v54 = vld [vmem:[%s2582_s25 + $0x30] sm:$0xff] }
  0xaa   : > { %v704_v51 = vld [vmem:[%s2576_s30 + $0x40] sm:$0xff]  ;;  %v703_v53 = vld [vmem:[%s2576_s30 + $0x38] sm:$0xff]  ;;  %v702_v55 = vld [vmem:[%s2576_s30 + $0x30] sm:$0xff] }
  0xab   : > { %584 = vmatpush1.xpose.msra.mxu0 %v565_v20  ;;  %v548_v56 = vld [vmem:[%s2582_s25 + $0x28] sm:$0xff]  ;;  %v547_v58 = vld [vmem:[%s2582_s25 + $0x20] sm:$0xff]  ;;  %v546_v60 = vld [vmem:[%s2582_s25 + $0x18] sm:$0xff] }
  0xac   : > { %737 = vmatpush1.xpose.msra.mxu1 %v718_v21  ;;  %585 = vmatprep.subr.mxu0 %v564_v22  ;;  %v701_v57 = vld [vmem:[%s2576_s30 + $0x28] sm:$0xff]  ;;  %v700_v59 = vld [vmem:[%s2576_s30 + $0x20] sm:$0xff]  ;;  %v699_v61 = vld [vmem:[%s2576_s30 + $0x18] sm:$0xff] }
  0xad   : > { %738 = vmatprep.subr.mxu1 %v717_v23  ;;  %v545_v62 = vld [vmem:[%s2582_s25 + $0x10] sm:$0xff]  ;;  %v544_v0 = vld [vmem:[%s2582_s25 + $0x8] sm:$0xff]  ;;  %v543_v2 = vld [vmem:[%s2582_s25] sm:$0xff] }
  0xae   : > { %v698_v63 = vld [vmem:[%s2576_s30 + $0x10] sm:$0xff]  ;;  %v697_v1 = vld [vmem:[%s2576_s30 + $0x8] sm:$0xff]  ;;  %v696_v3 = vld [vmem:[%s2576_s30] sm:$0xff] }
  0xaf   : > { %586 = vmatpush1.xpose.msra.mxu0 %v563_v24  ;;  %v527_v4 = vld [vmem:[%s2562_s18] sm:$0xff]  ;;  %v530_v6 = vld [vmem:[%s2562_s18 + $0x18] sm:$0xff]  ;;  %v529_v8 = vld [vmem:[%s2562_s18 + $0x10] sm:$0xff] }
  0xb0   : > { %739 = vmatpush1.xpose.msra.mxu1 %v716_v25  ;;  %587 = vmatprep.subr.mxu0 %v562_v26  ;;  %v680_v5 = vld [vmem:[%s2569_s4] sm:$0xff]  ;;  %v683_v7 = vld [vmem:[%s2569_s4 + $0x18] sm:$0xff]  ;;  %v682_v9 = vld [vmem:[%s2569_s4 + $0x10] sm:$0xff] }
  0xb1   : > { %740 = vmatprep.subr.mxu1 %v715_v27  ;;  %v532_v10 = vld [vmem:[%s2562_s18 + $0x28] sm:$0xff]  ;;  %v531_v12 = vld [vmem:[%s2562_s18 + $0x20] sm:$0xff]  ;;  %v534_v14 = vld [vmem:[%s2562_s18 + $0x38] sm:$0xff] }
  0xb2   : > { %v685_v11 = vld [vmem:[%s2569_s4 + $0x28] sm:$0xff]  ;;  %v684_v13 = vld [vmem:[%s2569_s4 + $0x20] sm:$0xff]  ;;  %v687_v15 = vld [vmem:[%s2569_s4 + $0x38] sm:$0xff] }
  0xb3   : > { %588 = vmatpush1.xpose.msra.mxu0 %v561_v30  ;;  %v533_v16 = vld [vmem:[%s2562_s18 + $0x30] sm:$0xff]  ;;  %v536_v18 = vld [vmem:[%s2562_s18 + $0x48] sm:$0xff]  ;;  %v535_v20 = vld [vmem:[%s2562_s18 + $0x40] sm:$0xff] }
  0xb4   : > { %741 = vmatpush1.xpose.msra.mxu1 %v714_v31  ;;  %589 = vmatprep.subr.mxu0 %v560_v32  ;;  %v686_v17 = vld [vmem:[%s2569_s4 + $0x30] sm:$0xff]  ;;  %v689_v19 = vld [vmem:[%s2569_s4 + $0x48] sm:$0xff]  ;;  %v688_v21 = vld [vmem:[%s2569_s4 + $0x40] sm:$0xff] }
  0xb5   : > { %742 = vmatprep.subr.mxu1 %v713_v33  ;;  %v538_v22 = vld [vmem:[%s2562_s18 + $0x58] sm:$0xff]  ;;  %v537_v24 = vld [vmem:[%s2562_s18 + $0x50] sm:$0xff]  ;;  %v540_v26 = vld [vmem:[%s2562_s18 + $0x68] sm:$0xff] }
  0xb6   : > { %v691_v23 = vld [vmem:[%s2569_s4 + $0x58] sm:$0xff]  ;;  %v690_v25 = vld [vmem:[%s2569_s4 + $0x50] sm:$0xff]  ;;  %v693_v27 = vld [vmem:[%s2569_s4 + $0x68] sm:$0xff] }
  0xb7   : > { %590 = vmatpush1.xpose.msra.mxu0 %v559_v34  ;;  %v539_v28 = vld [vmem:[%s2562_s18 + $0x60] sm:$0xff]  ;;  %v542_v30 = vld [vmem:[%s2562_s18 + $0x78] sm:$0xff]  ;;  %v541_v32 = vld [vmem:[%s2562_s18 + $0x70] sm:$0xff] }
  0xb8   : > { %743 = vmatpush1.xpose.msra.mxu1 %v712_v35  ;;  %591 = vmatprep.subr.mxu0 %v558_v36  ;;  %v692_v29 = vld [vmem:[%s2569_s4 + $0x60] sm:$0xff]  ;;  %v695_v31 = vld [vmem:[%s2569_s4 + $0x78] sm:$0xff]  ;;  %v694_v33 = vld [vmem:[%s2569_s4 + $0x70] sm:$0xff] }
  0xb9   : > { %744 = vmatprep.subr.mxu1 %v711_v37  ;;  %v2737_v36 = vld [vmem:[%s485_s17] ss:$0 sm:$0xff] }
  0xbb   : > { %592 = vmatpush1.xpose.msra.mxu0 %v557_v38 }
  0xbc   : > { %745 = vmatpush1.xpose.msra.mxu1 %v710_v39  ;;  %593 = vmatprep.subr.mxu0 %v556_v40 }
  0xbd   : > { %746 = vmatprep.subr.mxu1 %v709_v41  ;;  %v2744_v41 = vld [vmem:[%s488_s24] ss:$0 sm:$0xff] }
  0xbf   : > { %594 = vmatpush1.xpose.msra.mxu0 %v555_v42 }
  0xc0   : > { %747 = vmatpush1.xpose.msra.mxu1 %v708_v43  ;;  %595 = vmatprep.subr.mxu0 %v554_v44 }
  0xc1   : > { %748 = vmatprep.subr.mxu1 %v707_v45 }
  0xc3   : > { %596 = vmatpush1.xpose.msra.mxu0 %v553_v46 }
  0xc4   : > { %749 = vmatpush1.xpose.msra.mxu1 %v706_v47  ;;  %597 = vmatprep.subr.mxu0 %v552_v48 }
  0xc5   : > { %750 = vmatprep.subr.mxu1 %v705_v49 }
  0xc7   : > { %598 = vmatpush1.xpose.msra.mxu0 %v551_v50 }
  0xc8   : > { %751 = vmatpush1.xpose.msra.mxu1 %v704_v51  ;;  %599 = vmatprep.subr.mxu0 %v550_v52 }
  0xc9   : > { %752 = vmatprep.subr.mxu1 %v703_v53 }
  0xcb   : > { %600 = vmatpush1.xpose.msra.mxu0 %v549_v54 }
  0xcc   : > { %753 = vmatpush1.xpose.msra.mxu1 %v702_v55  ;;  %601 = vmatprep.subr.mxu0 %v548_v56 }
  0xcd   : > { %754 = vmatprep.subr.mxu1 %v701_v57 }
  0xcf   : > { %602 = vmatpush1.xpose.msra.mxu0 %v547_v58 }
  0xd0   : > { %755 = vmatpush1.xpose.msra.mxu1 %v700_v59  ;;  %603 = vmatprep.subr.mxu0 %v546_v60 }
  0xd1   : > { %756 = vmatprep.subr.mxu1 %v699_v61 }
  0xd3   : > { %604 = vmatpush1.xpose.msra.mxu0 %v545_v62 }
  0xd4   : > { %757 = vmatpush1.xpose.msra.mxu1 %v698_v63  ;;  %605 = vmatprep.subr.mxu0 %v544_v0 }
  0xd5   : > { %758 = vmatprep.subr.mxu1 %v697_v1 }
  0xd7   : > { %606 = vmatpush1.xpose.msra.mxu0 %v543_v2 }
  0xd8   : > { %759 = vmatpush1.xpose.msra.mxu1 %v696_v3 }
  0xda   : > { %640 = vmatmul.mubr.f32.vlgmr.msra.gmra.mxu0 %v527_v4 }
  0xdb   : > { %793 = vmatmul.mubr.f32.vlgmr.msra.gmra.mxu1 %v680_v5  ;;  %644 = vmatprep.mubr.f32.mxu0 %v530_v6  ;;  %v2285_v5 = vmov 0  }
  0xdc   : > { %797 = vmatprep.mubr.f32.mxu1 %v683_v7  ;;  %1931 = vset.pattern.permute.xlu0 %v2285_v5 }
  0xdd   : > { %1932 = vset.pattern.permute.xlu1 %v2285_v5 }
  0xde   : > { %645 = vmatmul.mubr.f32.gmra.mxu0 %v529_v8 }
  0xdf   : > { %798 = vmatmul.mubr.f32.gmra.mxu1 %v682_v9  ;;  %649 = vmatprep.mubr.f32.mxu0 %v532_v10 }
  0xe0   : > { %802 = vmatprep.mubr.f32.mxu1 %v685_v11 }
  0xe2   : > { %650 = vmatmul.mubr.f32.gmra.mxu0 %v531_v12 }
  0xe3   : > { %803 = vmatmul.mubr.f32.gmra.mxu1 %v684_v13  ;;  %654 = vmatprep.mubr.f32.mxu0 %v534_v14 }
  0xe4   : > { %807 = vmatprep.mubr.f32.mxu1 %v687_v15 }
  0xe6   : > { %655 = vmatmul.mubr.f32.gmra.mxu0 %v533_v16 }
  0xe7   : > { %808 = vmatmul.mubr.f32.gmra.mxu1 %v686_v17  ;;  %659 = vmatprep.mubr.f32.mxu0 %v536_v18 }
  0xe8   : > { %812 = vmatprep.mubr.f32.mxu1 %v689_v19 }
  0xea   : > { %660 = vmatmul.mubr.f32.gmra.mxu0 %v535_v20 }
  0xeb   : > { %813 = vmatmul.mubr.f32.gmra.mxu1 %v688_v21  ;;  %664 = vmatprep.mubr.f32.mxu0 %v538_v22 }
  0xec   : > { %817 = vmatprep.mubr.f32.mxu1 %v691_v23 }
  0xee   : > { %665 = vmatmul.mubr.f32.gmra.mxu0 %v537_v24 }
  0xef   : > { %818 = vmatmul.mubr.f32.gmra.mxu1 %v690_v25  ;;  %669 = vmatprep.mubr.f32.mxu0 %v540_v26 }
  0xf0   : > { %822 = vmatprep.mubr.f32.mxu1 %v693_v27 }
  0xf2   : > { %670 = vmatmul.mubr.f32.gmra.mxu0 %v539_v28 }
  0xf3   : > { %823 = vmatmul.mubr.f32.gmra.mxu1 %v692_v29  ;;  %674 = vmatprep.mubr.f32.mxu0 %v542_v30 }
  0xf4   : > { %827 = vmatprep.mubr.f32.mxu1 %v695_v31 }
  0xf6   : > { %675 = vmatmul.mubr.f32.gmra.mxu0 %v541_v32 }
  0xf7   : > { %828 = vmatmul.mubr.f32.gmra.mxu1 %v694_v33 }
 0x19a   : > { %v641_v34 = vpop.f32.mrf.mxu0 }
 0x19b   : > { %v794_v35 = vpop.f32.mrf.mxu1  ;;  %v833_v37 = vmul.f32 10.0, %v641_v34 }
 0x19c   : > { %v856_v38 = vmul.f32 10.0, %v794_v35  ;;  %v643_v39 = vpop.f32.mrf.mxu0 }
 0x19d   : > { %v796_v40 = vpop.f32.mrf.mxu1  ;;  %v2747_v42 = vsub.f32 %v833_v37, %v2737_v36 }
 0x19e   : > { %v646_v43 = vpop.f32.mrf.mxu0  ;;  %v2751_v47 = vsub.f32 %v856_v38, %v2744_v41  ;;  %v2810_v38 = vld [vmem:[#allocation2] sm:$0xff] }
 0x19f   : > { %v799_v44 = vpop.f32.mrf.mxu1  ;;  %v834_v45 = vmul.f32 10.0, %v646_v43  ;;  %887 = vmax.xlane.f32.xlu0 %v2747_v42  ;;  %v2815_v43 = vld [vmem:[#allocation4 + $0x8] sm:$0xff] }
 0x1a0   : > { %v857_v46 = vmul.f32 10.0, %v799_v44  ;;  %v648_v48 = vpop.f32.mrf.mxu0 }
 0x1a1   : > { %v801_v49 = vpop.f32.mrf.mxu1  ;;  %v2759_v55 = vsub.f32 %v834_v45, %v2737_v36 }
 0x1a2   : > { %v2754_v50 = vsub.f32 %v857_v46, %v2744_v41  ;;  %v651_v51 = vpop.f32.mrf.mxu0  ;;  %v2830_v49 = vld [vmem:[#allocation2 + $0x8] sm:$0xff] }
 0x1a3   : > { %v804_v52 = vpop.f32.mrf.mxu1  ;;  %v835_v53 = vmul.f32 10.0, %v651_v51  ;;  %1064 = vmax.xlane.f32.xlu0 %v2751_v47  ;;  %v2832_v51 = vld [vmem:[#allocation2 + $0x10] sm:$0xff] }
 0x1a4   : > { %1066 = vmax.xlane.f32.xlu1 %v2754_v50  ;;  %v858_v54 = vmul.f32 10.0, %v804_v52  ;;  %v653_v56 = vpop.f32.mrf.mxu0 }
 0x1a5   : > { %v806_v57 = vpop.f32.mrf.mxu1  ;;  %v2762_v58 = vsub.f32 %v835_v53, %v2737_v36 }
 0x1a6   : > { %v656_v59 = vpop.f32.mrf.mxu0  ;;  %v2767_v63 = vsub.f32 %v858_v54, %v2744_v41 }
 0x1a7   : > { %v809_v60 = vpop.f32.mrf.mxu1  ;;  %v836_v61 = vmul.f32 10.0, %v656_v59  ;;  %889 = vmax.xlane.f32.xlu0 %v2759_v55 }
 0x1a8   : > { %891 = vmax.xlane.f32.xlu1 %v2762_v58  ;;  %v859_v62 = vmul.f32 10.0, %v809_v60  ;;  %v658_v0 = vpop.f32.mrf.mxu0  ;;  %v2850_v60 = vld [vmem:[#allocation2 + $0x18] sm:$0xff] }
 0x1a9   : > { %v811_v1 = vpop.f32.mrf.mxu1  ;;  %v2770_v2 = vsub.f32 %v836_v61, %v2737_v36  ;;  %v2852_v61 = vld [vmem:[#allocation4 + $0x10] sm:$0xff] }
 0x1aa   : > { %v661_v3 = vpop.f32.mrf.mxu0  ;;  %v2775_v8 = vsub.f32 %v859_v62, %v2744_v41 }
 0x1ab   : > { %v814_v4 = vpop.f32.mrf.mxu1  ;;  %v837_v6 = vmul.f32 10.0, %v661_v3  ;;  %1068 = vmax.xlane.f32.xlu0 %v2767_v63 }
 0x1ac   : > { %893 = vmax.xlane.f32.xlu1 %v2770_v2  ;;  %v860_v7 = vmul.f32 10.0, %v814_v4  ;;  %v663_v9 = vpop.f32.mrf.mxu0 }
 0x1ad   : > { %v816_v10 = vpop.f32.mrf.mxu1  ;;  %v2778_v11 = vsub.f32 %v837_v6, %v2737_v36  ;;  %v2869_v6 = vld [vmem:[#allocation4 + $0x18] sm:$0xff] }
 0x1ae   : > { %v666_v12 = vpop.f32.mrf.mxu0  ;;  %v2783_v16 = vsub.f32 %v860_v7, %v2744_v41  ;;  %v2871_v7 = vld [vmem:[#allocation2 + $0x20] sm:$0xff] }
 0x1af   : > { %v819_v13 = vpop.f32.mrf.mxu1  ;;  %v838_v14 = vmul.f32 10.0, %v666_v12  ;;  %895 = vmax.xlane.f32.xlu0 %v2778_v11 }
 0x1b0   : > { %1070 = vmax.xlane.f32.xlu1 %v2775_v8  ;;  %v861_v15 = vmul.f32 10.0, %v819_v13  ;;  %v668_v17 = vpop.f32.mrf.mxu0 }
 0x1b1   : > { %v821_v18 = vpop.f32.mrf.mxu1  ;;  %v2786_v19 = vsub.f32 %v838_v14, %v2737_v36  ;;  %v2888_v17 = vld [vmem:[#allocation2 + $0x28] sm:$0xff] }
 0x1b2   : > { %v671_v20 = vpop.f32.mrf.mxu0  ;;  %v2790_v24 = vsub.f32 %v861_v15, %v2744_v41  ;;  %v2890_v18 = vld [vmem:[#allocation4 + $0x20] sm:$0xff] }
 0x1b3   : > { %v824_v21 = vpop.f32.mrf.mxu1  ;;  %v839_v22 = vmul.f32 10.0, %v671_v20  ;;  %1072 = vmax.xlane.f32.xlu0 %v2783_v16 }
 0x1b4   : > { %897 = vmax.xlane.f32.xlu1 %v2786_v19  ;;  %v862_v23 = vmul.f32 10.0, %v824_v21  ;;  %v673_v25 = vpop.f32.mrf.mxu0 }
 0x1b5   : > { %v826_v26 = vpop.f32.mrf.mxu1  ;;  %v2794_v27 = vsub.f32 %v839_v22, %v2737_v36 }
 0x1b6   : > { %v676_v28 = vpop.f32.mrf.mxu0  ;;  %v2799_v32 = vsub.f32 %v862_v23, %v2744_v41 }
 0x1b7   : > { %v829_v29 = vpop.f32.mrf.mxu1  ;;  %v840_v30 = vmul.f32 10.0, %v676_v28  ;;  %899 = vmax.xlane.f32.xlu0 %v2794_v27  ;;  %v2908_v28 = vld [vmem:[#allocation4 + $0x28] sm:$0xff] }
 0x1b8   : > { %1074 = vmax.xlane.f32.xlu1 %v2790_v24  ;;  %v863_v31 = vmul.f32 10.0, %v829_v29  ;;  %v678_v33 = vpop.f32.mrf.mxu0  ;;  %v2910_v29 = vld [vmem:[#allocation2 + $0x30] sm:$0xff] }
 0x1b9   : > { %v831_v34 = vpop.f32.mrf.mxu1  ;;  %v2802_v35 = vsub.f32 %v840_v30, %v2737_v36  ;;  %v2817_v36 = vld [vmem:[#allocation4] sm:$0xff] }
 0x1ba   : > { %v2806_v37 = vsub.f32 %v863_v31, %v2744_v41 }
 0x1bb   : > { %1076 = vmax.xlane.f32.xlu0 %v2799_v32 }
 0x1bc   : > { %901 = vmax.xlane.f32.xlu1 %v2802_v35 }
 0x1c0   : > { %1078 = vmax.xlane.f32.xlu1 %v2806_v37 }
 0x228   : > { %v888_v39 = vpop.xlane.xlu0 %887 }
 0x229   : > { %v2813_v40 = vmax.f32 %v2810_v38, %v888_v39 }
 0x22b   : > { %v911_v44 = vsub.f32 %v2810_v38, %v2813_v40  ;;  %1048 = vst.msk [vmem:[#allocation2] sm:$0xff] %vm1039_vm1, %v2813_v40  ;;  %953 = vperm.xlu0 %1931, %v2813_v40  }
 0x22c   : > { %v1065_v45 = vpop.xlane.xlu0 %1064 }
 0x22d   : > { %v1067_v41 = vpop.xlane.xlu1 %1066  ;;  %v2828_v48 = vmax.f32 %v2817_v36, %v1065_v45  ;;  %v2927_v45 = vld [vmem:[#allocation2 + $0x38] sm:$0xff] }
 0x22e   : > { %v2825_v46 = vmax.f32 %v2815_v43, %v1067_v41 }
 0x22f   : > { %v1088_v53 = vsub.f32 %v2817_v36, %v2828_v48  ;;  %1224 = vst.msk [vmem:[#allocation4] sm:$0xff] %vm1039_vm1, %v2828_v48  ;;  %1130 = vperm.xlu1 %1932, %v2828_v48  }
 0x230   : > { %v1089_v52 = vsub.f32 %v2815_v43, %v2825_v46  ;;  %1225 = vst.msk [vmem:[#allocation4 + $0x8] sm:$0xff] %vm1039_vm1, %v2825_v46  ;;  %1135 = vperm.xlu0 %1931, %v2825_v46   ;;  %v890_v54 = vpop.xlane.xlu0 %889 }
 0x231   : > { %v892_v56 = vpop.xlane.xlu1 %891  ;;  %v2845_v57 = vmax.f32 %v2830_v49, %v890_v54  ;;  %v2929_v54 = vld [vmem:[#allocation4 + $0x30] sm:$0xff] }
 0x232   : > { %v2848_v59 = vmax.f32 %v2832_v51, %v892_v56 }
 0x233   : > { %1049 = vst.msk [vmem:[#allocation2 + $0x8] sm:$0xff] %vm1039_vm1, %v2845_v57  ;;  %958 = vperm.xlu1 %1932, %v2845_v57  }
 0x234   : > { %1050 = vst.msk [vmem:[#allocation2 + $0x10] sm:$0xff] %vm1039_vm1, %v2848_v59  ;;  %v1069_v3 = vpop.xlane.xlu0 %1068  ;;  %v3402_v38 = vsub.f32 %v2832_v51, %v2848_v59  ;;  %v1112_v51 = vld [vmem:[#allocation5] sm:$0xff] }
 0x235   : > { %v894_v1 = vpop.xlane.xlu1 %893  ;;  %v2867_v5 = vmax.f32 %v2852_v61, %v1069_v3 }
 0x236   : > { %v2864_v4 = vmax.f32 %v2850_v60, %v894_v1  ;;  %v923_v40 = vmul.f32 1.442695, %v3402_v38  ;;  %v939_v38 = vld [vmem:[#allocation3 + $0x20] sm:$0xff] }
 0x237   : > { %963 = vperm.xlu1 %1932, %v2848_v59   ;;  %1226 = vst.msk [vmem:[#allocation4 + $0x10] sm:$0xff] %vm1039_vm1, %v2867_v5  ;;  %v3403_v43 = vsub.f32 %v2852_v61, %v2867_v5 }
 0x238   : > { %1051 = vst.msk [vmem:[#allocation2 + $0x18] sm:$0xff] %vm1039_vm1, %v2864_v4  ;;  %v896_v13 = vpop.xlane.xlu0 %895  ;;  %v3404_v36 = vsub.f32 %v2850_v60, %v2864_v4 }
 0x239   : > { %v1071_v12 = vpop.xlane.xlu1 %1070  ;;  %v2886_v15 = vmax.f32 %v2871_v7, %v896_v13  ;;  %v1100_v46 = vmul.f32 1.442695, %v3403_v43 }
 0x23a   : > { %v2883_v14 = vmax.f32 %v2869_v6, %v1071_v12  ;;  %v925_v48 = vmul.f32 1.442695, %v3404_v36 }
 0x23b   : > { %1140 = vperm.xlu1 %1932, %v2867_v5   ;;  %1052 = vst.msk [vmem:[#allocation2 + $0x20] sm:$0xff] %vm1039_vm1, %v2886_v15  ;;  %v3406_v60 = vsub.f32 %v2871_v7, %v2886_v15 }
 0x23c   : > { %1227 = vst.msk [vmem:[#allocation4 + $0x18] sm:$0xff] %vm1039_vm1, %v2883_v14  ;;  %1145 = vperm.xlu0 %1931, %v2883_v14   ;;  %v1073_v23 = vpop.xlane.xlu0 %1072  ;;  %v3405_v59 = vsub.f32 %v2869_v6, %v2883_v14 }
 0x23d   : > { %v898_v22 = vpop.xlane.xlu1 %897  ;;  %v2906_v26 = vmax.f32 %v2890_v18, %v1073_v23  ;;  %v2947_v23 = vld [vmem:[#allocation4 + $0x38] sm:$0xff] }
 0x23e   : > { %v2903_v25 = vmax.f32 %v2888_v17, %v898_v22 }
 0x23f   : > { %968 = vperm.xlu1 %1932, %v2864_v4   ;;  %1228 = vst.msk [vmem:[#allocation4 + $0x20] sm:$0xff] %vm1039_vm1, %v2906_v26  ;;  %v927_v4 = vmul.f32 1.442695, %v3406_v60  ;;  %v3407_v6 = vsub.f32 %v2890_v18, %v2906_v26 }
 0x240   : > { %1053 = vst.msk [vmem:[#allocation2 + $0x28] sm:$0xff] %vm1039_vm1, %v2903_v25  ;;  %v900_v34 = vpop.xlane.xlu0 %899 }
 0x241   : > { %v1075_v33 = vpop.xlane.xlu1 %1074  ;;  %v2925_v41 = vmax.f32 %v2910_v29, %v900_v34  ;;  %v1104_v14 = vmul.f32 1.442695, %v3407_v6 }
 0x242   : > { %v2922_v39 = vmax.f32 %v2908_v28, %v1075_v33 }
 0x243   : > { %973 = vperm.xlu1 %1932, %v2886_v15   ;;  %1054 = vst.msk [vmem:[#allocation2 + $0x30] sm:$0xff] %vm1039_vm1, %v2925_v41 }
 0x244   : > { %1229 = vst.msk [vmem:[#allocation4 + $0x28] sm:$0xff] %vm1039_vm1, %v2922_v39  ;;  %1155 = vperm.xlu0 %1931, %v2922_v39   ;;  %v1077_v12 = vpop.xlane.xlu0 %1076 }
 0x245   : > { %v902_v3 = vpop.xlane.xlu1 %901  ;;  %v2945_v22 = vmax.f32 %v2929_v54, %v1077_v12 }
 0x246   : > { %v2942_v13 = vmax.f32 %v2927_v45, %v902_v3 }
 0x247   : > { %1150 = vperm.xlu1 %1932, %v2906_v26   ;;  %1230 = vst.msk [vmem:[#allocation4 + $0x30] sm:$0xff] %vm1039_vm1, %v2945_v22  ;;  %v3409_v26 = vsub.f32 %v2910_v29, %v2925_v41 }
 0x248   : > { %1055 = vst.msk [vmem:[#allocation2 + $0x38] sm:$0xff] %vm1039_vm1, %v2942_v13  ;;  %v3411_v29 = vsub.f32 %v2927_v45, %v2942_v13 }
 0x249   : > { %v1079_v3 = vpop.xlane.xlu1 %1078 }
 0x24a   : > { %v2959_v12 = vmax.f32 %v2947_v23, %v1079_v3 }
 0x24b   : > { %978 = vperm.xlu1 %1932, %v2903_v25  }
 0x24c   : > { %1231 = vst.msk [vmem:[#allocation4 + $0x38] sm:$0xff] %vm1039_vm1, %v2959_v12  ;;  %1165 = vperm.xlu0 %1931, %v2959_v12  }
 0x24f   : > { %983 = vperm.xlu1 %1932, %v2925_v41   ;;  %v933_v41 = vmul.f32 1.442695, %v3411_v29 }
 0x253   : > { %988 = vperm.xlu1 %1932, %v2942_v13  }
 0x257   : > { %1160 = vperm.xlu1 %1932, %v2945_v22  }
 0x2a6   : > { %v954_v34 = vpop.permute.xlu0 %953 }
 0x2a7   : > { %v991_v3 = vsub.f32 %v2747_v42, %v954_v34 }
 0x2a9   : > { %v999_v33 = vmul.f32 1.442695, %v991_v3 }
 0x2aa   : > { %v1131_v30 = vpop.permute.xlu1 %1130 }
 0x2ab   : > { %v1136_v1 = vpop.permute.xlu0 %1135  ;;  %1933 = vpow2.f32 %v999_v33  ;;  %v1168_v31 = vsub.f32 %v2751_v47, %v1131_v30 }
 0x2ac   : > { %v1169_v56 = vsub.f32 %v2754_v50, %v1136_v1 }
 0x2ad   : > { %v1176_v20 = vmul.f32 1.442695, %v1168_v31 }
 0x2ae   : > { %v1178_v21 = vmul.f32 1.442695, %v1169_v56  ;;  %v959_v9 = vpop.permute.xlu1 %958 }
 0x2af   : > { %v992_v10 = vsub.f32 %v2759_v55, %v959_v9 }
 0x2b0   : > { %1935 = vpow2.f32 %v1178_v21 }
 0x2b1   : > { %1937 = vpow2.f32 %v1176_v20  ;;  %v1001_v0 = vmul.f32 1.442695, %v992_v10 }
 0x2b2   : > { %v964_v62 = vpop.permute.xlu1 %963 }
 0x2b3   : > { %1939 = vpow2.f32 %v1001_v0  ;;  %v993_v42 = vsub.f32 %v2762_v58, %v964_v62 }
 0x2b5   : > { %v1003_v34 = vmul.f32 1.442695, %v993_v42 }
 0x2b6   : > { %v1141_v3 = vpop.permute.xlu1 %1140 }
 0x2b7   : > { %1941 = vpow2.f32 %v1003_v34  ;;  %v1170_v33 = vsub.f32 %v2767_v63, %v1141_v3  ;;  %v1146_v1 = vpop.permute.xlu0 %1145 }
 0x2b8   : > { %v1934_v50 = vpop.eup %1933  ;;  %v1171_v21 = vsub.f32 %v2775_v8, %v1146_v1 }
 0x2b9   : > { %v1180_v47 = vmul.f32 1.442695, %v1170_v33  ;;  %1015 = vadd.xlane.f32.xlu1 %v1934_v50 }
 0x2ba   : > { %v969_v30 = vpop.permute.xlu1 %968  ;;  %v1182_v62 = vmul.f32 1.442695, %v1171_v21 }
 0x2bb   : > { %v994_v55 = vsub.f32 %v2770_v2, %v969_v30  ;;  %1943 = vpow2.f32 %v1180_v47 }
 0x2bd   : > { %v1936_v9 = vpop.eup %1935  ;;  %v1005_v0 = vmul.f32 1.442695, %v994_v55 }
 0x2be   : > { %v1938_v10 = vpop.eup %1937  ;;  %1194 = vadd.xlane.f32.xlu1 %v1936_v9  ;;  %v974_v58 = vpop.permute.xlu1 %973 }
 0x2bf   : > { %1192 = vadd.xlane.f32.xlu0 %v1938_v10  ;;  %1945 = vpow2.f32 %v1005_v0  ;;  %v995_v63 = vsub.f32 %v2778_v11, %v974_v58  ;;  %v1156_v2 = vpop.permute.xlu0 %1155 }
 0x2c0   : > { %v1940_v20 = vpop.eup %1939  ;;  %1947 = vpow2.f32 %v1182_v62  ;;  %v1173_v50 = vsub.f32 %v2790_v24, %v1156_v2 }
 0x2c1   : > { %v1007_v31 = vmul.f32 1.442695, %v995_v63 }
 0x2c2   : > { %v1151_v56 = vpop.permute.xlu1 %1150  ;;  %v1186_v55 = vmul.f32 1.442695, %v1173_v50  ;;  %v3401_v50 = vsub.f32 %v2830_v49, %v2845_v57  ;;  %v1113_v57 = vld [vmem:[#allocation5 + $0x8] sm:$0xff] }
 0x2c3   : > { %1017 = vadd.xlane.f32.xlu0 %v1940_v20  ;;  %v1172_v8 = vsub.f32 %v2783_v16, %v1151_v56  ;;  %1949 = vpow2.f32 %v1007_v31 }
 0x2c4   : > { %v1942_v42 = vpop.eup %1941 }
 0x2c5   : > { %v1184_v34 = vmul.f32 1.442695, %v1172_v8 }
 0x2c6   : > { %v979_v3 = vpop.permute.xlu1 %978 }
 0x2c7   : > { %1019 = vadd.xlane.f32.xlu0 %v1942_v42  ;;  %1951 = vpow2.f32 %v1184_v34  ;;  %v996_v33 = vsub.f32 %v2786_v19, %v979_v3  ;;  %v1166_v16 = vpop.permute.xlu0 %1165  ;;  %v1098_v3 = vmul.f32 1.442695, %v1089_v52  ;;  %v935_v52 = vld [vmem:[#allocation3] sm:$0xff] }
 0x2c8   : > { %v1944_v1 = vpop.eup %1943  ;;  %v1175_v19 = vsub.f32 %v2806_v37, %v1166_v16 }
 0x2c9   : > { %v1009_v11 = vmul.f32 1.442695, %v996_v33  ;;  %v1096_v33 = vmul.f32 1.442695, %v1088_v53 }
 0x2ca   : > { %v984_v47 = vpop.permute.xlu1 %983  ;;  %v1190_v31 = vmul.f32 1.442695, %v1175_v19 }
 0x2cb   : > { %1196 = vadd.xlane.f32.xlu0 %v1944_v1  ;;  %v997_v30 = vsub.f32 %v2794_v27, %v984_v47  ;;  %1953 = vpow2.f32 %v1009_v11  ;;  %v921_v1 = vmul.f32 1.442695, %v3401_v50 }
 0x2cc   : > { %v1946_v21 = vpop.eup %1945 }
 0x2cd   : > { %v1011_v9 = vmul.f32 1.442695, %v997_v30  ;;  %1021 = vadd.xlane.f32.xlu1 %v1946_v21  ;;  %v1948_v58 = vpop.eup %1947  ;;  %v1102_v21 = vmul.f32 1.442695, %v3405_v59 }
 0x2ce   : > { %v989_v10 = vpop.permute.xlu1 %988 }
 0x2cf   : > { %1955 = vpow2.f32 %v1011_v9  ;;  %v998_v0 = vsub.f32 %v2802_v35, %v989_v10 }
 0x2d0   : > { %1957 = vpow2.f32 %v1186_v55  ;;  %v1950_v24 = vpop.eup %1949 }
 0x2d1   : > { %v1013_v62 = vmul.f32 1.442695, %v998_v0  ;;  %1198 = vadd.xlane.f32.xlu1 %v1948_v58  ;;  %1023 = vadd.xlane.f32.xlu0 %v1950_v24  ;;  %v936_v0 = vld [vmem:[#allocation3 + $0x8] sm:$0xff]  ;;  %v937_v24 = vld [vmem:[#allocation3 + $0x10] sm:$0xff] }
 0x2d2   : > { %v1161_v63 = vpop.permute.xlu1 %1160 }
 0x2d3   : > { %1959 = vpow2.f32 %v1013_v62  ;;  %v1174_v27 = vsub.f32 %v2799_v32, %v1161_v63  ;;  %v919_v32 = vmul.f32 1.442695, %v911_v44  ;;  %v3408_v63 = vsub.f32 %v2888_v17, %v2903_v25  ;;  %v938_v25 = vld [vmem:[#allocation3 + $0x18] sm:$0xff] }
 0x2d4   : > { %v1952_v20 = vpop.eup %1951 }
 0x2d5   : > { %v1188_v56 = vmul.f32 1.442695, %v1174_v27  ;;  %1200 = vadd.xlane.f32.xlu0 %v1952_v20  ;;  %v929_v27 = vmul.f32 1.442695, %v3408_v63 }
 0x2d7   : > { %1961 = vpow2.f32 %v1188_v56 }
 0x2d8   : > { %1963 = vpow2.f32 %v1190_v31  ;;  %v1954_v8 = vpop.eup %1953 }
 0x2d9   : > { %1025 = vadd.xlane.f32.xlu1 %v1954_v8  ;;  %1965 = vpow2.f32 %v919_v32  ;;  %v1114_v8 = vld [vmem:[#allocation5 + $0x10] sm:$0xff] }
 0x2da   : > { %1967 = vpow2.f32 %v1098_v3 }
 0x2db   : > { %1969 = vpow2.f32 %v1096_v33 }
 0x2dc   : > { %v1956_v35 = vpop.eup %1955  ;;  %1971 = vpow2.f32 %v921_v1  ;;  %v1115_v1 = vld [vmem:[#allocation5 + $0x18] sm:$0xff] }
 0x2dd   : > { %v1958_v42 = vpop.eup %1957  ;;  %1027 = vadd.xlane.f32.xlu0 %v1956_v35  ;;  %1973 = vpow2.f32 %v923_v40  ;;  %v931_v35 = vmul.f32 1.442695, %v3409_v26  ;;  %v3412_v40 = vsub.f32 %v2929_v54, %v2945_v22 }
 0x2de   : > { %1202 = vadd.xlane.f32.xlu1 %v1958_v42  ;;  %1975 = vpow2.f32 %v1100_v46  ;;  %v3413_v46 = vsub.f32 %v2947_v23, %v2959_v12 }
 0x2df   : > { %1977 = vpow2.f32 %v925_v48 }
 0x2e0   : > { %v1960_v37 = vpop.eup %1959  ;;  %1979 = vpow2.f32 %v1102_v21  ;;  %v1110_v45 = vmul.f32 1.442695, %v3413_v46 }
 0x2e1   : > { %1981 = vpow2.f32 %v927_v4 }
 0x2e2   : > { %1029 = vadd.xlane.f32.xlu1 %v1960_v37  ;;  %1983 = vpow2.f32 %v1104_v14  ;;  %v3410_v37 = vsub.f32 %v2908_v28, %v2922_v39 }
 0x2e3   : > { %1985 = vpow2.f32 %v929_v27 }
 0x2e4   : > { %v1962_v2 = vpop.eup %1961  ;;  %1987 = vpow2.f32 %v931_v35 }
 0x2e5   : > { %v1964_v34 = vpop.eup %1963  ;;  %1204 = vadd.xlane.f32.xlu0 %v1962_v2  ;;  %v1106_v2 = vmul.f32 1.442695, %v3410_v37 }
 0x2e6   : > { %1206 = vadd.xlane.f32.xlu1 %v1964_v34  ;;  %v1966_v44 = vpop.eup %1965 }
 0x2e7   : > { %v943_v53 = vmul.f32 %v1966_v44, %v935_v52  ;;  %v1968_v11 = vpop.eup %1967  ;;  %1989 = vpow2.f32 %v1106_v2  ;;  %v1108_v44 = vmul.f32 1.442695, %v3412_v40 }
 0x2e8   : > { %v1970_v47 = vpop.eup %1969  ;;  %v1121_v61 = vmul.f32 %v1968_v11, %v1113_v57  ;;  %1991 = vpow2.f32 %v933_v41  ;;  %v1116_v11 = vld [vmem:[#allocation5 + $0x20] sm:$0xff] }
 0x2e9   : > { %v1120_v5 = vmul.f32 %v1970_v47, %v1112_v51  ;;  %v1972_v16 = vpop.eup %1971  ;;  %1993 = vpow2.f32 %v1108_v44  ;;  %v940_v47 = vld [vmem:[#allocation3 + $0x28] sm:$0xff]  ;;  %v941_v51 = vld [vmem:[#allocation3 + $0x30] sm:$0xff] }
 0x2ea   : > { %v944_v19 = vmul.f32 %v1972_v16, %v936_v0  ;;  %v1974_v7 = vpop.eup %1973  ;;  %1995 = vpow2.f32 %v1110_v45  ;;  %v942_v0 = vld [vmem:[#allocation3 + $0x38] sm:$0xff] }
 0x2eb   : > { %v945_v20 = vmul.f32 %v1974_v7, %v937_v24  ;;  %v1976_v31 = vpop.eup %1975  ;;  %v1119_v24 = vld [vmem:[#allocation5 + $0x38] sm:$0xff] }
 0x2ec   : > { %v1978_v42 = vpop.eup %1977  ;;  %v1122_v17 = vmul.f32 %v1976_v31, %v1114_v8 }
 0x2ed   : > { %v946_v3 = vmul.f32 %v1978_v42, %v938_v25  ;;  %v1980_v33 = vpop.eup %1979 }
 0x2ee   : > { %v1982_v28 = vpop.eup %1981  ;;  %v1123_v43 = vmul.f32 %v1980_v33, %v1115_v1 }
 0x2ef   : > { %v947_v13 = vmul.f32 %v1982_v28, %v939_v38  ;;  %v1984_v36 = vpop.eup %1983 }
 0x2f0   : > { %v1124_v54 = vmul.f32 %v1984_v36, %v1116_v11  ;;  %v1986_v22 = vpop.eup %1985 }
 0x2f1   : > { %v1988_v23 = vpop.eup %1987  ;;  %v948_v12 = vmul.f32 %v1986_v22, %v940_v47 }
 0x2f2   : > { %v949_v4 = vmul.f32 %v1988_v23, %v941_v51 }
 0x2f4   : > { %v1990_v59 = vpop.eup %1989 }
 0x2f5   : > { %v1992_v16 = vpop.eup %1991 }
 0x2f6   : > { %v1994_v6 = vpop.eup %1993  ;;  %v950_v14 = vmul.f32 %v1992_v16, %v942_v0 }
 0x2f7   : > { %v1996_v7 = vpop.eup %1995 }
 0x342   : > { %v1016_v49 = vpop.xlane.xlu1 %1015 }
 0x343   : > { %v1031_v30 = vadd.f32 %v1016_v49, %v943_v53 }
 0x345   : > { %1040 = vst.msk [vmem:[#allocation3] sm:$0xff] %vm1039_vm1, %v1031_v30 }
 0x347   : > { %v1195_v55 = vpop.xlane.xlu1 %1194 }
 0x348   : > { %v1193_v9 = vpop.xlane.xlu0 %1192  ;;  %v1209_v10 = vadd.f32 %v1195_v55, %v1121_v61  ;;  %v1117_v61 = vld [vmem:[#allocation5 + $0x28] sm:$0xff] }
 0x349   : > { %v1208_v58 = vadd.f32 %v1193_v9, %v1120_v5  ;;  %v1125_v55 = vmul.f32 %v1990_v59, %v1117_v61 }
 0x34a   : > { %1217 = vst.msk [vmem:[#allocation5 + $0x8] sm:$0xff] %vm1039_vm1, %v1209_v10 }
 0x34b   : > { %1216 = vst.msk [vmem:[#allocation5] sm:$0xff] %vm1039_vm1, %v1208_v58 }
 0x34c   : > { %v1018_v15 = vpop.xlane.xlu0 %1017 }
 0x34d   : > { %v1032_v62 = vadd.f32 %v1018_v15, %v944_v19  ;;  %v1118_v19 = vld [vmem:[#allocation5 + $0x30] sm:$0xff] }
 0x34e   : > { %v1126_v63 = vmul.f32 %v1994_v6, %v1118_v19 }
 0x34f   : > { %1041 = vst.msk [vmem:[#allocation3 + $0x8] sm:$0xff] %vm1039_vm1, %v1032_v62 }
 0x350   : > { %v1020_v56 = vpop.xlane.xlu0 %1019 }
 0x351   : > { %v1033_v18 = vadd.f32 %v1020_v56, %v945_v20  ;;  %v1127_v20 = vmul.f32 %v1996_v7, %v1119_v24 }
 0x353   : > { %1042 = vst.msk [vmem:[#allocation3 + $0x10] sm:$0xff] %vm1039_vm1, %v1033_v18 }
 0x354   : > { %v1197_v34 = vpop.xlane.xlu0 %1196 }
 0x355   : > { %v1210_v32 = vadd.f32 %v1197_v34, %v1122_v17 }
 0x356   : > { %v1022_v50 = vpop.xlane.xlu1 %1021 }
 0x357   : > { %1218 = vst.msk [vmem:[#allocation5 + $0x10] sm:$0xff] %vm1039_vm1, %v1210_v32  ;;  %v1034_v39 = vadd.f32 %v1022_v50, %v946_v3 }
 0x359   : > { %1043 = vst.msk [vmem:[#allocation3 + $0x18] sm:$0xff] %vm1039_vm1, %v1034_v39 }
 0x35a   : > { %v1199_v52 = vpop.xlane.xlu1 %1198  ;;  %v1024_v48 = vpop.xlane.xlu0 %1023 }
 0x35b   : > { %v1211_v53 = vadd.f32 %v1199_v52, %v1123_v43  ;;  %v1035_v49 = vadd.f32 %v1024_v48, %v947_v13 }
 0x35d   : > { %1219 = vst.msk [vmem:[#allocation5 + $0x18] sm:$0xff] %vm1039_vm1, %v1211_v53  ;;  %1044 = vst.msk [vmem:[#allocation3 + $0x20] sm:$0xff] %vm1039_vm1, %v1035_v49 }
 0x35e   : > { %v1201_v57 = vpop.xlane.xlu0 %1200 }
 0x35f   : > { %v1212_v30 = vadd.f32 %v1201_v57, %v1124_v54 }
 0x361   : > { %1220 = vst.msk [vmem:[#allocation5 + $0x20] sm:$0xff] %vm1039_vm1, %v1212_v30 }
 0x362   : > { %v1026_v21 = vpop.xlane.xlu1 %1025 }
 0x363   : > { %v1036_v60 = vadd.f32 %v1026_v21, %v948_v12 }
 0x365   : > { %1045 = vst.msk [vmem:[#allocation3 + $0x28] sm:$0xff] %vm1039_vm1, %v1036_v60 }
 0x366   : > { %v1028_v5 = vpop.xlane.xlu0 %1027 }
 0x367   : > { %v1037_v9 = vadd.f32 %v1028_v5, %v949_v4  ;;  %v1203_v10 = vpop.xlane.xlu1 %1202 }
 0x368   : > { %v1213_v58 = vadd.f32 %v1203_v10, %v1125_v55 }
 0x369   : > { %1046 = vst.msk [vmem:[#allocation3 + $0x30] sm:$0xff] %vm1039_vm1, %v1037_v9 }
 0x36a   : > { %1221 = vst.msk [vmem:[#allocation5 + $0x28] sm:$0xff] %vm1039_vm1, %v1213_v58 }
 0x36b   : > { %v1030_v15 = vpop.xlane.xlu1 %1029 }
 0x36c   : > { %v1038_v62 = vadd.f32 %v1030_v15, %v950_v14 }
 0x36e   : > { %1047 = vst.msk [vmem:[#allocation3 + $0x38] sm:$0xff] %vm1039_vm1, %v1038_v62  ;;  %v1205_v27 = vpop.xlane.xlu0 %1204  ;;  %1235 = sbr.rel (%p1791_p7) target bundleno = 1208 (0x4b8), region = 76 }
 0x36f   : > { %v1214_v31 = vadd.f32 %v1205_v27, %v1126_v63  ;;  %v1207_v56 = vpop.xlane.xlu1 %1206 }
 0x370   : > { %v1215_v8 = vadd.f32 %v1207_v56, %v1127_v20 }
 0x371   : > { %1222 = vst.msk [vmem:[#allocation5 + $0x30] sm:$0xff] %vm1039_vm1, %v1214_v31 }
 0x372   : > { %1223 = vst.msk [vmem:[#allocation5 + $0x38] sm:$0xff] %vm1039_vm1, %v1215_v8 }
 0x373   : > { %v1270_v18 = vlaneseq  ;;  %v1268_v35 = vld [vmem:[%s3414_s19] sm:$0x3]  ;;  %v3058_v37 = vld [vmem:[%s2562_s18 + $0x28] sm:$0xff]  ;;  %v3086_v28 = vld [vmem:[%s2562_s18 + $0x30] sm:$0xff] }
 0x374   : > { %v3055_v42 = vld [vmem:[%s2562_s18 + $0x20] sm:$0xff]  ;;  %v3064_v34 = vld [vmem:[%s2569_s4 + $0x28] sm:$0xff]  ;;  %v3089_v39 = vld [vmem:[%s2562_s18 + $0x38] sm:$0xff] }
 0x375   : > { %v1271_v26 = vshrl.u32 %v1270_v18, 7  ;;  %v3061_v25 = vld [vmem:[%s2569_s4 + $0x20] sm:$0xff]  ;;  %v3077_v41 = vld [vmem:[%s2562_s18 + $0x8] sm:$0xff]  ;;  %v3096_v44 = vld [vmem:[%s2569_s4 + $0x30] sm:$0xff] }
 0x376   : > { %v1344_v32 = vld [vmem:[%s3415_s2] sm:$0x3]  ;;  %v3083_v1 = vld [vmem:[%s2569_s4 + $0x8] sm:$0xff]  ;;  %v3099_v43 = vld [vmem:[%s2562_s18 + $0x10] sm:$0xff] }
 0x377   : > { %v1272_v2 = vsub.s32 0, %v1271_v26  ;;  %v1276_v17 = vsub.s32 1, %v1271_v26  ;;  %v3074_v29 = vld [vmem:[%s2562_s18] sm:$0xff]  ;;  %v3102_v46 = vld [vmem:[%s2562_s18 + $0x18] sm:$0xff]  ;;  %v3116_v53 = vld [vmem:[%s2569_s4 + $0x10] sm:$0xff] }
 0x378   : > { %v3080_v50 = vld [vmem:[%s2569_s4] sm:$0xff]  ;;  %v3113_v48 = vld [vmem:[%s2569_s4 + $0x38] sm:$0xff]  ;;  %v3119_v11 = vld [vmem:[%s2562_s18 + $0x50] sm:$0xff] }
 0x379   : > { %v3069_v3 = vrot.slane %v1268_v35, %v1272_v2  ;;  %v3071_v33 = vrot.slane %v1268_v35, %v1276_v17  ;;  %v3104_v45 = vrot.slane %v1344_v32, %v1272_v2  ;;  %v3106_v13 = vrot.slane %v1344_v32, %v1276_v17  ;;  %v1255_v47 = vld [vmem:[%s2569_s4 + $0x18] sm:$0xff]  ;;  %v3132_v23 = vld [vmem:[%s2569_s4 + $0x50] sm:$0xff]  ;;  %v3144_v60 = vld [vmem:[%s2562_s18 + $0x40] sm:$0xff] }
 0x37a   : > { %v3129_v30 = vld [vmem:[%s2562_s18 + $0x58] sm:$0xff]  ;;  %v3147_v4 = vld [vmem:[%s2562_s18 + $0x48] sm:$0xff]  ;;  %v3154_v10 = vld [vmem:[%s2569_s4 + $0x40] sm:$0xff] }
 0x37b   : > { %v1284_v38 = vsub.f32 %v3055_v42, %v3069_v3  ;;  %v1285_v40 = vsub.f32 %v3058_v37, %v3071_v33  ;;  %v1280_v52 = vsub.f32 %v3074_v29, %v3069_v3  ;;  %v1281_v36 = vsub.f32 %v3077_v41, %v3071_v33  ;;  %v3141_v61 = vld [vmem:[%s2569_s4 + $0x58] sm:$0xff]  ;;  %v3157_v0 = vld [vmem:[%s2562_s18 + $0x70] sm:$0xff]  ;;  %v3166_v15 = vld [vmem:[%s2569_s4 + $0x48] sm:$0xff] }
 0x37c   : > { %v1286_v22 = vsub.f32 %v3086_v28, %v3069_v3  ;;  %v1287_v57 = vsub.f32 %v3089_v39, %v3071_v33  ;;  %v1282_v59 = vsub.f32 %v3099_v43, %v3069_v3  ;;  %v1283_v21 = vsub.f32 %v3102_v46, %v3071_v33  ;;  %v3160_v58 = vld [vmem:[%s2562_s18 + $0x78] sm:$0xff]  ;;  %v3169_v24 = vld [vmem:[%s2562_s18 + $0x60] sm:$0xff]  ;;  %v3172_v62 = vld [vmem:[%s2562_s18 + $0x68] sm:$0xff] }
 0x37d   : > { %v1300_v49 = vmul.f32 %v1284_v38, %v3061_v25  ;;  %v1301_v54 = vmul.f32 %v1285_v40, %v3064_v34  ;;  %v1296_v12 = vmul.f32 %v1280_v52, %v3080_v50  ;;  %v1297_v51 = vmul.f32 %v1281_v36, %v3083_v1  ;;  %v3180_v56 = vld [vmem:[%s2569_s4 + $0x70] sm:$0xff]  ;;  %v3183_v8 = vld [vmem:[%s2569_s4 + $0x78] sm:$0xff]  ;;  %v1264_v38 = vld [vmem:[%s2569_s4 + $0x60] sm:$0xff] }
 0x37e   : > { %v1302_v55 = vmul.f32 %v1286_v22, %v3096_v44  ;;  %v1303_v16 = vmul.f32 %v1287_v57, %v3113_v48  ;;  %v1290_v9 = vsub.f32 %v3119_v11, %v3069_v3  ;;  %v1298_v14 = vmul.f32 %v1282_v59, %v3116_v53  ;;  %v1265_v40 = vld [vmem:[%s2569_s4 + $0x68] sm:$0xff] }
 0x37f   : > { %v1318_v5 = vadd.f32 %v1301_v54, %v1300_v49  ;;  %v1312_v6 = vadd.f32 %v1297_v51, %v1296_v12  ;;  %v1299_v19 = vmul.f32 %v1283_v21, %v1255_v47  ;;  %v1291_v7 = vsub.f32 %v3129_v30, %v3071_v33 }
 0x380   : > { %v1321_v63 = vadd.f32 %v1303_v16, %v1302_v55  ;;  %v1306_v27 = vmul.f32 %v1290_v9, %v3132_v23  ;;  %v1288_v20 = vsub.f32 %v3144_v60, %v3069_v3  ;;  %v1289_v31 = vsub.f32 %v3147_v4, %v3071_v33 }
 0x381   : > { %1319 = vadd.xlane.f32.xlu1 %v1318_v5  ;;  %1313 = vadd.xlane.f32.xlu0 %v1312_v6  ;;  %v1315_v18 = vadd.f32 %v1299_v19, %v1298_v14  ;;  %v1307_v26 = vmul.f32 %v1291_v7, %v3141_v61  ;;  %v1294_v35 = vsub.f32 %v3157_v0, %v3069_v3 }
 0x382   : > { %v1295_v2 = vsub.f32 %v3160_v58, %v3071_v33  ;;  %v1304_v17 = vmul.f32 %v1288_v20, %v3154_v10  ;;  %v1305_v32 = vmul.f32 %v1289_v31, %v3166_v15  ;;  %v1292_v52 = vsub.f32 %v3169_v24, %v3069_v3 }
 0x383   : > { %v1293_v36 = vsub.f32 %v3172_v62, %v3071_v33  ;;  %v1310_v49 = vmul.f32 %v1294_v35, %v3180_v56  ;;  %v1356_v22 = vsub.f32 %v3080_v50, %v3104_v45  ;;  %v1327_v57 = vadd.f32 %v1307_v26, %v1306_v27  ;;  %v1430_v26 = vld [vmem:[#allocation3 + $0x10] sm:$0xff]  ;;  %v1431_v35 = vld [vmem:[#allocation3 + $0x18] sm:$0xff] }
 0x384   : > { %v1311_v54 = vmul.f32 %v1295_v2, %v3183_v8  ;;  %v1358_v12 = vsub.f32 %v3116_v53, %v3104_v45  ;;  %v1359_v51 = vsub.f32 %v1255_v47, %v3106_v13  ;;  %v1357_v3 = vsub.f32 %v3083_v1, %v3106_v13 }
 0x385   : > { %1322 = vadd.xlane.f32.xlu1 %v1321_v63  ;;  %1316 = vadd.xlane.f32.xlu0 %v1315_v18  ;;  %v1324_v59 = vadd.f32 %v1305_v32, %v1304_v17  ;;  %v1308_v33 = vmul.f32 %v1292_v52, %v1264_v38  ;;  %v1309_v21 = vmul.f32 %v1293_v36, %v1265_v40  ;;  %v1429_v18 = vld [vmem:[#allocation3 + $0x8] sm:$0xff]  ;;  %v1472_v17 = vld [vmem:[#allocation5 + $0x20] sm:$0xff] }
 0x386   : > { %v1360_v5 = vsub.f32 %v3061_v25, %v3104_v45  ;;  %v1361_v50 = vsub.f32 %v3064_v34, %v3106_v13  ;;  %v1333_v55 = vadd.f32 %v1311_v54, %v1310_v49  ;;  %v1374_v16 = vmul.f32 %v1358_v12, %v3099_v43  ;;  %v1473_v52 = vld [vmem:[#allocation5 + $0x28] sm:$0xff] }
 0x387   : > { %v1375_v53 = vmul.f32 %v1359_v51, %v3102_v46  ;;  %v1362_v47 = vsub.f32 %v3096_v44, %v3104_v45  ;;  %v1363_v1 = vsub.f32 %v3113_v48, %v3106_v13  ;;  %v1330_v9 = vadd.f32 %v1309_v21, %v1308_v33  ;;  %v1433_v54 = vld [vmem:[#allocation3 + $0x28] sm:$0xff]  ;;  %v1474_v51 = vld [vmem:[#allocation5 + $0x30] sm:$0xff] }
 0x388   : > { %v1372_v6 = vmul.f32 %v1356_v22, %v3074_v29  ;;  %v1373_v25 = vmul.f32 %v1357_v3, %v3077_v41  ;;  %v1376_v34 = vmul.f32 %v1360_v5, %v3055_v42  ;;  %v1377_v14 = vmul.f32 %v1361_v50, %v3058_v37  ;;  %v1434_v33 = vld [vmem:[#allocation3 + $0x30] sm:$0xff] }
 0x389   : > { %1328 = vadd.xlane.f32.xlu1 %v1327_v57  ;;  %1325 = vadd.xlane.f32.xlu0 %v1324_v59  ;;  %v1366_v43 = vsub.f32 %v3132_v23, %v3104_v45  ;;  %v1391_v46 = vadd.f32 %v1375_v53, %v1374_v16  ;;  %v1378_v44 = vmul.f32 %v1362_v47, %v3086_v28  ;;  %v1421_v47 = vld [vmem:[#allocation2 + $0x8] sm:$0xff] }
 0x38a   : > { %v1379_v19 = vmul.f32 %v1363_v1, %v3089_v39  ;;  %v1367_v48 = vsub.f32 %v3141_v61, %v3106_v13  ;;  %v1388_v29 = vadd.f32 %v1373_v25, %v1372_v6  ;;  %v1364_v41 = vsub.f32 %v3154_v10, %v3104_v45 }
 0x38b   : > { %v1365_v42 = vsub.f32 %v3166_v15, %v3106_v13  ;;  %v1394_v37 = vadd.f32 %v1377_v14, %v1376_v34  ;;  %v1382_v23 = vmul.f32 %v1366_v43, %v3119_v11  ;;  %v1370_v39 = vsub.f32 %v3180_v56, %v3104_v45  ;;  %v1420_v34 = vld [vmem:[#allocation2] sm:$0xff] }
 0x38c   : > { %v1397_v7 = vadd.f32 %v1379_v19, %v1378_v44  ;;  %v1383_v28 = vmul.f32 %v1367_v48, %v3129_v30  ;;  %v1371_v61 = vsub.f32 %v3183_v8, %v3106_v13  ;;  %v1380_v63 = vmul.f32 %v1364_v41, %v3144_v60  ;;  %v1460_v43 = vld [vmem:[#allocation4] sm:$0xff]  ;;  %v1422_v19 = vld [vmem:[#allocation2 + $0x10] sm:$0xff]  ;;  %v1435_v41 = vld [vmem:[#allocation3 + $0x38] sm:$0xff] }
 0x38d   : > { %1334 = vadd.xlane.f32.xlu1 %v1333_v55  ;;  %1331 = vadd.xlane.f32.xlu0 %v1330_v9  ;;  %v1381_v10 = vmul.f32 %v1365_v42, %v3147_v4  ;;  %v1368_v15 = vsub.f32 %v1264_v38, %v3104_v45  ;;  %v1369_v27 = vsub.f32 %v1265_v40, %v3106_v13  ;;  %v2286_v45 = vmov 0   ;;  %v1428_v13 = vld [vmem:[#allocation3] sm:$0xff]  ;;  %v1475_v55 = vld [vmem:[#allocation5 + $0x38] sm:$0xff]  ;;  %v1461_v9 = vld [vmem:[#allocation4 + $0x8] sm:$0xff] }
 0x38e   : > { %v1403_v11 = vadd.f32 %v1383_v28, %v1382_v23  ;;  %v1386_v20 = vmul.f32 %v1370_v39, %v3157_v0  ;;  %v1387_v30 = vmul.f32 %v1371_v61, %v3160_v58  ;;  %1998 = vset.pattern.permute.xlu1 %v2286_v45  ;;  %1997 = vset.pattern.permute.xlu0 %v2286_v45  ;;  %v1469_v0 = vld [vmem:[#allocation5 + $0x8] sm:$0xff]  ;;  %1999 = vlog2.f32 %v1428_v13  ;;  %v1468_v58 = vld [vmem:[#allocation5] sm:$0xff] }
 0x38f   : > { %v1400_v31 = vadd.f32 %v1381_v10, %v1380_v63  ;;  %v1384_v56 = vmul.f32 %v1368_v15, %v3169_v24  ;;  %v1385_v8 = vmul.f32 %v1369_v27, %v3172_v62  ;;  %2001 = vlog2.f32 %v1429_v18  ;;  %v1471_v24 = vld [vmem:[#allocation5 + $0x18] sm:$0xff]  ;;  %v1470_v62 = vld [vmem:[#allocation5 + $0x10] sm:$0xff]  ;;  %v1432_v38 = vld [vmem:[#allocation3 + $0x20] sm:$0xff] }
 0x390   : > { %v1409_v60 = vadd.f32 %v1387_v30, %v1386_v20  ;;  %2003 = vlog2.f32 %v1469_v0  ;;  %v1463_v63 = vld [vmem:[#allocation4 + $0x18] sm:$0xff] }
 0x391   : > { %1392 = vadd.xlane.f32.xlu1 %v1391_v46  ;;  %1389 = vadd.xlane.f32.xlu0 %v1388_v29  ;;  %v1406_v4 = vadd.f32 %v1385_v8, %v1384_v56  ;;  %2005 = vlog2.f32 %v1468_v58  ;;  %v1423_v8 = vld [vmem:[#allocation2 + $0x18] sm:$0xff] }
 0x392   : > { %2007 = vlog2.f32 %v1430_v26 }
 0x393   : > { %2009 = vlog2.f32 %v1471_v24 }
 0x394   : > { %2011 = vlog2.f32 %v1470_v62 }
 0x395   : > { %1398 = vadd.xlane.f32.xlu1 %v1397_v7  ;;  %1395 = vadd.xlane.f32.xlu0 %v1394_v37  ;;  %2013 = vlog2.f32 %v1431_v35  ;;  %v1464_v35 = vld [vmem:[#allocation4 + $0x20] sm:$0xff] }
 0x396   : > { %2015 = vlog2.f32 %v1472_v17 }
 0x397   : > { %2017 = vlog2.f32 %v1432_v38 }
 0x398   : > { %2019 = vlog2.f32 %v1473_v52 }
 0x399   : > { %1404 = vadd.xlane.f32.xlu1 %v1403_v11  ;;  %1401 = vadd.xlane.f32.xlu0 %v1400_v31  ;;  %2021 = vlog2.f32 %v1433_v54  ;;  %v1462_v11 = vld [vmem:[#allocation4 + $0x10] sm:$0xff] }
 0x39a   : > { %2023 = vlog2.f32 %v1474_v51 }
 0x39b   : > { %v2000_v49 = vpop.eup %1999  ;;  %2025 = vlog2.f32 %v1434_v33 }
 0x39c   : > { %v2002_v22 = vpop.eup %2001  ;;  %v1437_v53 = vmul.f32 0.6931472, %v2000_v49  ;;  %2027 = vlog2.f32 %v1475_v55 }
 0x39d   : > { %1410 = vadd.xlane.f32.xlu1 %v1409_v60  ;;  %1407 = vadd.xlane.f32.xlu0 %v1406_v4  ;;  %v2004_v57 = vpop.eup %2003  ;;  %v1439_v5 = vmul.f32 0.6931472, %v2002_v22  ;;  %2029 = vlog2.f32 %v1435_v41  ;;  %v1424_v22 = vld [vmem:[#allocation2 + $0x20] sm:$0xff] }
 0x39e   : > { %v2006_v3 = vpop.eup %2005  ;;  %v1479_v50 = vmul.f32 0.6931472, %v2004_v57  ;;  %v1452_v7 = vadd.f32 %v1437_v53, %v1420_v34 }
 0x39f   : > { %v2008_v21 = vpop.eup %2007  ;;  %v1477_v6 = vmul.f32 0.6931472, %v2006_v3  ;;  %v1453_v48 = vadd.f32 %v1439_v5, %v1421_v47 }
 0x3a0   : > { %v2010_v16 = vpop.eup %2009  ;;  %v1441_v46 = vmul.f32 0.6931472, %v2008_v21  ;;  %v1493_v42 = vadd.f32 %v1479_v50, %v1461_v9 }
 0x3a1   : > { %v2012_v25 = vpop.eup %2011  ;;  %v1483_v37 = vmul.f32 0.6931472, %v2010_v16  ;;  %v1492_v61 = vadd.f32 %v1477_v6, %v1460_v43  ;;  %v1465_v16 = vld [vmem:[#allocation4 + $0x28] sm:$0xff] }
 0x3a2   : > { %v2014_v44 = vpop.eup %2013  ;;  %v1481_v10 = vmul.f32 0.6931472, %v2012_v25  ;;  %v1454_v30 = vadd.f32 %v1441_v46, %v1422_v19 }
 0x3a3   : > { %v2016_v23 = vpop.eup %2015  ;;  %v1443_v31 = vmul.f32 0.6931472, %v2014_v44  ;;  %v1495_v45 = vadd.f32 %v1483_v37, %v1463_v63 }
 0x3a4   : > { %v2018_v20 = vpop.eup %2017  ;;  %v1485_v13 = vmul.f32 0.6931472, %v2016_v23  ;;  %v1494_v62 = vadd.f32 %v1481_v10, %v1462_v11  ;;  %v1466_v23 = vld [vmem:[#allocation4 + $0x30] sm:$0xff] }
 0x3a5   : > { %v2020_v18 = vpop.eup %2019  ;;  %v1445_v17 = vmul.f32 0.6931472, %v2018_v20  ;;  %v1455_v49 = vadd.f32 %v1443_v31, %v1423_v8  ;;  %v1467_v31 = vld [vmem:[#allocation4 + $0x38] sm:$0xff] }
 0x3a6   : > { %v1487_v3 = vmul.f32 0.6931472, %v2020_v18  ;;  %v1496_v33 = vadd.f32 %v1485_v13, %v1464_v35 }
 0x3a7   : > { %v1456_v9 = vadd.f32 %v1445_v17, %v1424_v22 }
 0x40a   : > { %v3245_v2 = vpop.xlane.xlu1 %1319  ;;  %v1314_v32 = vpop.xlane.xlu0 %1313 }
 0x40b   : > { %v1336_v28 = vmul.f32 10.0, %v1314_v32  ;;  %v1338_v0 = vmul.f32 10.0, %v3245_v2 }
 0x40d   : > { %v1500_v58 = vsub.f32 %v1452_v7, %v1336_v28  ;;  %v1502_v5 = vsub.f32 %v1454_v30, %v1338_v0 }
 0x40e   : > { %v3247_v40 = vpop.xlane.xlu1 %1322  ;;  %v1317_v36 = vpop.xlane.xlu0 %1316 }
 0x40f   : > { %v1337_v29 = vmul.f32 10.0, %v1317_v36  ;;  %v2022_v36 = vpop.eup %2021  ;;  %v1339_v54 = vmul.f32 10.0, %v3247_v40 }
 0x410   : > { %v2024_v2 = vpop.eup %2023  ;;  %v1447_v47 = vmul.f32 0.6931472, %v2022_v36 }
 0x411   : > { %v1501_v60 = vsub.f32 %v1453_v48, %v1337_v29  ;;  %v2026_v34 = vpop.eup %2025  ;;  %v1503_v43 = vsub.f32 %v1455_v49, %v1339_v54  ;;  %v1425_v48 = vld [vmem:[#allocation2 + $0x28] sm:$0xff]  ;;  %v1497_v29 = vadd.f32 %v1487_v3, %v1465_v16  ;;  %v1489_v41 = vmul.f32 0.6931472, %v2024_v2 }
 0x412   : > { %v3249_v12 = vpop.xlane.xlu1 %1328  ;;  %v3251_v59 = vpop.xlane.xlu0 %1325 }
 0x413   : > { %v1340_v40 = vmul.f32 10.0, %v3251_v59  ;;  %v2028_v19 = vpop.eup %2027  ;;  %v1341_v63 = vmul.f32 10.0, %v3249_v12  ;;  %v1498_v20 = vadd.f32 %v1489_v41, %v1466_v23  ;;  %v1427_v12 = vld [vmem:[#allocation2 + $0x38] sm:$0xff] }
 0x414   : > { %v2030_v59 = vpop.eup %2029  ;;  %v1491_v11 = vmul.f32 0.6931472, %v2028_v19 }
 0x415   : > { %v1504_v10 = vsub.f32 %v1456_v9, %v1340_v40  ;;  %v1451_v13 = vmul.f32 0.6931472, %v2030_v59 }
 0x416   : > { %v3253_v1 = vpop.xlane.xlu1 %1334  ;;  %v3255_v14 = vpop.xlane.xlu0 %1331 }
 0x417   : > { %v1342_v0 = vmul.f32 10.0, %v3255_v14  ;;  %v1459_v17 = vadd.f32 %v1451_v13, %v1427_v12 }
 0x41a   : > { %v1393_v39 = vpop.xlane.xlu1 %1392  ;;  %v1390_v27 = vpop.xlane.xlu0 %1389 }
 0x41b   : > { %v1413_v15 = vmul.f32 10.0, %v1393_v39  ;;  %v1412_v56 = vmul.f32 10.0, %v1390_v27  ;;  %v1426_v27 = vld [vmem:[#allocation2 + $0x30] sm:$0xff] }
 0x41d   : > { %v1509_v4 = vsub.f32 %v1493_v42, %v1413_v15  ;;  %v1508_v26 = vsub.f32 %v1492_v61, %v1412_v56  ;;  %v1457_v61 = vadd.f32 %v1447_v47, %v1425_v48  ;;  %v1449_v15 = vmul.f32 0.6931472, %v2026_v34 }
 0x41e   : > { %v1399_v24 = vpop.xlane.xlu1 %1398  ;;  %v1396_v38 = vpop.xlane.xlu0 %1395 }
 0x41f   : > { %v1415_v32 = vmul.f32 10.0, %v1399_v24  ;;  %v1517_v52 = vadd.f32 %v1509_v4, %v1501_v60  ;;  %v1414_v57 = vmul.f32 10.0, %v1396_v38  ;;  %v1516_v51 = vadd.f32 %v1508_v26, %v1500_v58 }
 0x420   : > { %v1458_v18 = vadd.f32 %v1449_v15, %v1426_v27  ;;  %v1499_v58 = vadd.f32 %v1491_v11, %v1467_v31 }
 0x421   : > { %v1525_v21 = vmul.f32 0.5, %v1517_v52  ;;  %v1511_v50 = vsub.f32 %v1495_v45, %v1415_v32  ;;  %v1510_v55 = vsub.f32 %v1494_v62, %v1414_v57  ;;  %v1524_v53 = vmul.f32 0.5, %v1516_v51 }
 0x422   : > { %v1405_v6 = vpop.xlane.xlu1 %1404  ;;  %v1402_v25 = vpop.xlane.xlu0 %1401  ;;  %v1505_v45 = vsub.f32 %v1457_v61, %v1341_v63  ;;  %v1343_v32 = vmul.f32 10.0, %v3253_v1  ;;  %v1506_v38 = vsub.f32 %v1458_v18, %v1342_v0 }
 0x423   : > { %1539 = vperm.xlu1 %1998, %v1525_v21   ;;  %v1416_v46 = vmul.f32 10.0, %v1402_v25  ;;  %1534 = vperm.xlu0 %1997, %v1524_v53   ;;  %v1518_v44 = vadd.f32 %v1510_v55, %v1502_v5  ;;  %v1417_v42 = vmul.f32 10.0, %v1405_v6  ;;  %v1519_v28 = vadd.f32 %v1511_v50, %v1503_v43 }
 0x424   : > { %v1507_v14 = vsub.f32 %v1459_v17, %v1343_v32 }
 0x425   : > { %v1512_v37 = vsub.f32 %v1496_v33, %v1416_v46  ;;  %v1526_v7 = vmul.f32 0.5, %v1518_v44  ;;  %v1513_v30 = vsub.f32 %v1497_v29, %v1417_v42  ;;  %v1527_v8 = vmul.f32 0.5, %v1519_v28 }
 0x426   : > { %v1408_v39 = vpop.xlane.xlu0 %1407  ;;  %v1411_v4 = vpop.xlane.xlu1 %1410 }
 0x427   : > { %1544 = vperm.xlu1 %1998, %v1526_v7   ;;  %v1418_v56 = vmul.f32 10.0, %v1408_v39  ;;  %v1520_v60 = vadd.f32 %v1512_v37, %v1504_v10  ;;  %v1419_v26 = vmul.f32 10.0, %v1411_v4  ;;  %v1521_v35 = vadd.f32 %v1513_v30, %v1505_v45 }
 0x429   : > { %v1514_v24 = vsub.f32 %v1498_v20, %v1418_v56  ;;  %v1528_v62 = vmul.f32 0.5, %v1520_v60  ;;  %v1515_v52 = vsub.f32 %v1499_v58, %v1419_v26  ;;  %v1529_v36 = vmul.f32 0.5, %v1521_v35 }
 0x42b   : > { %1549 = vperm.xlu1 %1998, %v1527_v8   ;;  %v1522_v49 = vadd.f32 %v1514_v24, %v1506_v38  ;;  %v1523_v22 = vadd.f32 %v1515_v52, %v1507_v14 }
 0x42d   : > { %v1530_v54 = vmul.f32 0.5, %v1522_v49  ;;  %v1531_v57 = vmul.f32 0.5, %v1523_v22 }
 0x42f   : > { %1554 = vperm.xlu1 %1998, %v1528_v62  }
 0x433   : > { %1559 = vperm.xlu1 %1998, %v1529_v36  }
 0x437   : > { %1564 = vperm.xlu1 %1998, %v1530_v54  }
 0x43b   : > { %1569 = vperm.xlu1 %1998, %v1531_v57  }
 0x49e   : > { %v1540_v1 = vpop.permute.xlu1 %1539  ;;  %v1535_v51 = vpop.permute.xlu0 %1534 }
 0x49f   : > { %1573 = vst [vmem:[%s2601_s6 + $0x8] sm:$0xff] %v1540_v1  ;;  %1572 = vst [vmem:[%s2601_s6] sm:$0xff] %v1535_v51 }
 0x4a2   : > { %v1545_v3 = vpop.permute.xlu1 %1544 }
 0x4a3   : > { %1574 = vst [vmem:[%s2601_s6 + $0x10] sm:$0xff] %v1545_v3 }
 0x4a6   : > { %v1550_v33 = vpop.permute.xlu1 %1549 }
 0x4a7   : > { %1575 = vst [vmem:[%s2601_s6 + $0x18] sm:$0xff] %v1550_v33 }
 0x4aa   : > { %v1555_v21 = vpop.permute.xlu1 %1554 }
 0x4ab   : > { %1576 = vst [vmem:[%s2601_s6 + $0x20] sm:$0xff] %v1555_v21 }
 0x4ae   : > { %v1560_v2 = vpop.permute.xlu1 %1559 }
 0x4af   : > { %1577 = vst [vmem:[%s2601_s6 + $0x28] sm:$0xff] %v1560_v2 }
 0x4b2   : > { %v1565_v5 = vpop.permute.xlu1 %1564 }
 0x4b3   : > { %1578 = vst [vmem:[%s2601_s6 + $0x30] sm:$0xff] %v1565_v5 }
 0x4b6   : > { %v1570_v50 = vpop.permute.xlu1 %1569 }
 0x4b7   : > { %1579 = vst [vmem:[%s2601_s6 + $0x38] sm:$0xff] %v1570_v50 }
 0x4b8 PF: > { %s3416_s18 = sld [smem:[#allocation21_spill]]  ;;  %s1594_s5 = sshll.u32 %s2601_s6, 4  ;;  %s3278_s5 = int_to_ptr.vmem [resolvable:$true] %s1594_s5 }
 0x4b9   : > { %s3418_s8 = sld [smem:[#allocation33_spill]]  ;;  %s1581_s12 = scalar_lea.sflag [#allocation8], %s2558_s23 }
 0x4ba   : > { %s2143_s22 = scalar_lea.vmem %s3278_s5, 1024  ;;  %s2287_s30 = smov [#allocation14]  }
 0x4bb   : > { %p2144_p13 = scmp.ne.s32.totalorder %s3278_s5, %s2143_s22  ;;  %s2147_s16 = sshll.u32 %s2287_s30, 4  ;;  %s2148_s16 = int_to_ptr.vmem [resolvable:$false] %s2147_s16 }
 0x4bc   : > { %s2149_s25 = scalar_lea.vmem %s2148_s16, 2048  ;;  %p2150_p11 = scmp.lt.s32.totalorder %s3278_s5, %s2148_s16 }
 0x4bd   : > { %p2145_p3 = pnand %p2144_p13, %p2411_p8  ;;  %p2151_p12 = scmp.lt.s32.totalorder %s2149_s25, %s2143_s22 }
 0x4be   : > { %s1805_s17 = sshll.u32 %s3416_s18, 10 }
 0x4bf   : > { %s3275_s24 = scalar_lea.hbm %s3418_s8, %s1805_s17  ;;  %p2146_p10 = pneg %p2145_p3 }
 0x4c0   : > { %p2152_p4 = por %p2151_p12, %p2150_p11 }
 0x4c2   : > { %p2153_p5 = pnand %p2152_p4, %p2146_p10 }
 0x4c4   : > { %2156 = shalt.err (!%p2153_p5)
}
 0x4c5   : > { %s2157_s6 = scalar_lea.hbm %s3275_s24, 1024  ;;  %s2161_s19 = scalar_lea.hbm %s3418_s8, 4096 }
 0x4c6   : > { %p2158_p1 = scmp.ne.s32.totalorder %s3275_s24, %s2157_s6  ;;  %p2162_p2 = scmp.lt.s32.totalorder %s3275_s24, %s3418_s8 }
 0x4c7   : > { %p2163_p7 = scmp.lt.s32.totalorder %s2161_s19, %s2157_s6 }
 0x4c8   : > { %p2159_p0 = pnand %p2158_p1, %p2411_p8 }
 0x4c9   : > { %p2164_p13 = por %p2163_p7, %p2162_p2 }
 0x4ca   : > { %p2160_p6 = pneg %p2159_p0 }
 0x4cc   : > { %p2165_p3 = pnand %p2164_p13, %p2160_p6 }
 0x4ce   : > { %2168 = shalt.err (!%p2165_p3)
}
 0x4cf   : > { %s2288_s2 = smov 128   ;;  %s2289_s18 = smov 8  }
 0x4d0   : > { %1814 = dma.vmem_to_hbm [thread:$0]  (%p2411_p8), %s3278_s5, 1024, %s3275_s24, %s1581_s12, %s2288_s2, %s2288_s2, %s2289_s18  }
 0x4d1 PF: > { %s3419_s17 = sld [smem:[#allocation20_spill]]  ;;  %p1834_p10 = scmp.ge.s32.totalorder %s2275_s15, 2 }
 0x4d3   : > { %p1830_p11 = pnand %p1834_p10, %p2415_p9 }
 0x4d5   : > { %p1831_p12 = pneg %p1830_p11 }
 0x4d7   : > { %s1609_s1 = sand.u32 1, %s3419_s17  }
 0x4d8   : > { %s1610_s22 = scalar_lea.sflag [#allocation8], %s1609_s1 }
 0x4d9   : > { %2230 = dma.done.wait (%p1831_p12), %s1610_s22, 1024  }
 0x4da   : > { %2232 = vsyncadd (%p1831_p12), %s1610_s22, 4294966272  ;;  %s30_s15 = sadd.s32 1, %s2275_s15   ;;  %s3421_s23 = sld [smem:[#allocation24_spill]] }
 0x4db   : > { %p27_p4 = scmp.ge.s32.totalorder %s30_s15, 10   ;;  %s3422_s4 = sld [smem:[#allocation25_spill]] }
 0x4dc   : > { %s3423_s27 = smov %s2239_s28  ;;  %s3424_s28 = smov %s2243_s29 }
 0x4dd   : > { %s3425_s29 = smov %s2505_s7  ;;  %s3426_s30 = smov %s2251_s9 }
 0x4de   : > { %s3427_s9 = smov %s2255_s10  ;;  %s3428_s10 = smov %s2515_s26 }
 0x4df   : > { %s3429_s11 = smov %s2267_s13  ;;  %s3430_s12 = smov %s2271_s14 }
 0x4e0   : > { %s3431_s13 = smov %s3421_s23  ;;  %29 = sbr.rel (!%p27_p4) target bundleno = 22 (0x16), region = 148 }
 0x4e1   : > { %s3432_s14 = smov %s3422_s4 }
 0x4e5   :  { %1615 = vsyncpa [#allocation7], 1 }
 0x4e6   :  { %1617 = vsyncpa [#allocation7 + $0x1], 1 }
 0x4e7   :  { %1618 = vsyncpa [#allocation10], 1 }
 0x4e8   :  { %1620 = vsyncpa [#allocation10 + $0x1], 1 }
 0x4e9   :  { %1621 = vsyncpa [#allocation13], 1 }
 0x4ea   :  { %1623 = vsyncpa [#allocation13 + $0x1], 1 }
 0x4eb   :  { %1624 = vsyncpa [#allocation8], 1 }
 0x4ec   :  { %1626 = vsyncpa [#allocation8 + $0x1], 1 }

</bundles_post_ra>
